<compile_context>
chip_gen: v7x
topology: tpu7x:2x2x1
jax: 0.10.0
libtpu: 0.0.40
codegen_flags: <defaults>
</compile_context>

<pallas_src>
import functools

import jax
import jax.numpy as jnp
from jax.experimental import pallas as pl
from jax.experimental.pallas import tpu as pltpu


def classifier_kernel(
    ids_ref,     # SMEM (B, S) int32          scalar-prefetched token ids
    mask_ref,    # VMEM (tb, ts) f32          attention-mask tile
    emb_hbm,     # HBM  (V, H//2) uint32      packed bf16 embedding table
    w_ref,       # VMEM (H, CP) f32           head weights, rows = [even | odd]
    b_ref,       # VMEM (1, CP) f32           bias (padded lanes = -1e30)
    out_ref,     # VMEM (tb, CP) f32          softmax probabilities
    gbuf,        # VMEM (2, tb*ts, H//2) u32  double-buffered gathered rows
    gsem,        # DMA semaphores (2,)        one per gather slot
    acc_lo,      # VMEM (tb, H//2) f32        pooled sum, even features
    acc_hi,      # VMEM (tb, H//2) f32        pooled sum, odd features
    cnt,         # VMEM (tb, 1) f32           real-token counts
    *, tb, ts,
):
    bi = pl.program_id(0)
    si = pl.program_id(1)
    ns = pl.num_programs(1)
    b0 = bi * tb
    slot = si & 1

    @pl.when(si == 0)
    def _init():
        acc_lo[...] = jnp.zeros_like(acc_lo)
        acc_hi[...] = jnp.zeros_like(acc_hi)
        cnt[...] = jnp.zeros_like(cnt)

    # ---- fused embedding gather: one row DMA per token; every copy of a tile
    # signals the same per-slot semaphore so completion is ONE coalesced wait.
    # Nested loops avoid the per-row divmod and redundant address math.
    def issue_tile(seq_tile, dst_slot):
        s0 = seq_tile * ts

        def outer(i, c):
            row_base = i * ts

            def inner(j, c2):
                tok = ids_ref[b0 + i, s0 + j]
                pltpu.make_async_copy(
                    emb_hbm.at[pl.ds(tok, 1)],
                    gbuf.at[dst_slot, pl.ds(row_base + j, 1)],
                    gsem.at[dst_slot],
                ).start()
                return c2

            return jax.lax.fori_loop(0, ts, inner, c)

        jax.lax.fori_loop(0, tb, outer, 0)

    # Prologue: the first sequence tile of each batch tile is not overlapped.
    @pl.when(si == 0)
    def _prologue():
        issue_tile(0, 0)

    # Double-buffer: issue next tile's gathers (ids already live in SMEM) into
    # the other slot before waiting on / computing the current slot.
    @pl.when(si + 1 < ns)
    def _prefetch():
        issue_tile(si + 1, 1 - slot)

    # Single coalesced wait: descriptor covers the whole (tb*ts, H2) slab, i.e.
    # exactly the summed bytes of the tb*ts row copies started for this slot.
    pltpu.make_async_copy(gbuf.at[slot], gbuf.at[slot], gsem.at[slot]).wait()

    m = mask_ref[...]                                      # (tb, ts) f32, 0/1
    cnt[...] += jnp.sum(m, axis=1, keepdims=True)          # (tb, 1)

    # Unpack bf16 pairs (even = low 16 bits, odd = high 16) -> exact bf16.
    ui = gbuf[slot]                                        # (tb*ts, H2) uint32
    ev = pltpu.bitcast(ui << 16, jnp.float32).astype(jnp.bfloat16)
    od = pltpu.bitcast(ui & jnp.uint32(0xFFFF0000), jnp.float32).astype(jnp.bfloat16)

    # Block-diagonal masked pooling: one (tb, tb*ts) x (tb*ts, H2) matmul per
    # stream, f32 accumulation, whole-accumulator writes (no masked 1-row RMW).
    n = tb * ts
    row_id = jax.lax.broadcasted_iota(jnp.int32, (tb, n), 0)
    col_id = jax.lax.broadcasted_iota(jnp.int32, (tb, n), 1)
    lo = row_id * ts
    same_row = (col_id >= lo) & (col_id < lo + ts)
    m_rep = jnp.concatenate([m] * tb, axis=1)              # (tb, n): col r -> m[i, r % ts]
    md = jnp.where(same_row, m_rep, 0.0).astype(jnp.bfloat16)
    acc_lo[...] += jnp.dot(md, ev, preferred_element_type=jnp.float32)
    acc_hi[...] += jnp.dot(md, od, preferred_element_type=jnp.float32)

    # ---- epilogue on the last sequence tile: mean-pool, fused head, softmax.
    @pl.when(si == ns - 1)
    def _finalize():
        denom = jnp.maximum(cnt[...], 1.0)                 # guard all-padding rows
        pooled = jnp.concatenate(
            [acc_lo[...] / denom, acc_hi[...] / denom], axis=1)      # (tb, H)
        logits = jnp.dot(pooled, w_ref[...],
                         preferred_element_type=jnp.float32) + b_ref[...]
        mx = jnp.max(logits, axis=1, keepdims=True)
        e = jnp.exp(logits - mx)
        out_ref[...] = e / jnp.sum(e, axis=1, keepdims=True)


def model_wrapper_forward(input_ids, attention_mask, emb_table, w, b, *, tb=8, ts=128):
    """Pallas forward: fused gather -> masked mean pool -> head -> softmax(dim=1)."""
    B, S = input_ids.shape
    V, H = emb_table.shape
    C = w.shape[1]
    assert H % 2 == 0 and B % tb == 0 and S % ts == 0
    H2 = H // 2
    CP = 128                       # lane-dense padded class dimension
    nb, ns = B // tb, S // ts

    # Pack the bf16 embedding table two features per uint32 word: each gathered
    # row is a 32-bit aligned DMA while HBM traffic stays at bf16 size.
    eb = emb_table.astype(jnp.bfloat16)
    u16 = jax.lax.bitcast_convert_type(eb, jnp.uint16).astype(jnp.uint32)   # (V, H)
    emb_pk = (u16[:, 0::2] | (u16[:, 1::2] << 16)).astype(jnp.uint32)       # (V, H2)

    mask_f32 = attention_mask.astype(jnp.float32)

    # Single fused head weight laid out [even-feature rows | odd-feature rows]
    # on a 128-lane padded class dim (padded logits get -1e30 bias -> prob 0).
    w_f32 = w.astype(jnp.float32)
    w_cat = jnp.zeros((H, CP), jnp.float32)
    w_cat = w_cat.at[:H2, :C].set(w_f32[0::2, :])
    w_cat = w_cat.at[H2:, :C].set(w_f32[1::2, :])
    b_pad = jnp.full((1, CP), -1e30, dtype=jnp.float32).at[:, :C].set(
        b.reshape(1, C).astype(jnp.float32))

    grid_spec = pltpu.PrefetchScalarGridSpec(
        num_scalar_prefetch=1,
        grid=(nb, ns),
        in_specs=[
            pl.BlockSpec((tb, ts), lambda bi, si, ids: (bi, si)),   # mask tile
            pl.BlockSpec(memory_space=pl.ANY),                      # packed emb table (HBM)
            pl.BlockSpec((H, CP), lambda bi, si, ids: (0, 0)),      # head weight (resident)
            pl.BlockSpec((1, CP), lambda bi, si, ids: (0, 0)),      # bias (resident)
        ],
        out_specs=pl.BlockSpec((tb, CP), lambda bi, si, ids: (bi, 0)),
        scratch_shapes=[
            pltpu.VMEM((2, tb * ts, H2), jnp.uint32),   # double-buffered gather slab
            pltpu.SemaphoreType.DMA((2,)),              # one semaphore per slot
            pltpu.VMEM((tb, H2), jnp.float32),          # acc (even features)
            pltpu.VMEM((tb, H2), jnp.float32),          # acc (odd features)
            pltpu.VMEM((tb, 1), jnp.float32),           # token counts
        ],
    )

    # VMEM limit derived from actual usage (keeps v7x's 64 MiB/core happy).
    used = (2 * tb * ts * H2 * 4          # gather double buffer
            + 2 * tb * H2 * 4 + tb * 512  # accumulators + padded count
            + 2 * (H * CP + CP) * 4       # head weight + bias pipeline buffers
            + 2 * tb * ts * 4             # mask tiles
            + 2 * tb * CP * 4)            # output tiles
    vmem_limit = int(min(max(2 * used, 16 * 1024 * 1024), 40 * 1024 * 1024))

    out = pl.pallas_call(
        functools.partial(classifier_kernel, tb=tb, ts=ts),
        out_shape=jax.ShapeDtypeStruct((B, CP), jnp.float32),
        grid_spec=grid_spec,
        compiler_params=pltpu.CompilerParams(
            dimension_semantics=("parallel", "arbitrary"),
            vmem_limit_bytes=vmem_limit,
        ),
    )(input_ids.astype(jnp.int32), mask_f32, emb_pk, w_cat, b_pad)

    return out[:, :C]


if __name__ == "__main__":
    # Small synthetic shapes consistent with a sequence-classification forward.
    # B=16 with tb=8 gives nb=2 "parallel" batch steps (keeps both v7x cores
    # busy); seq/hidden are multiples of 128 so (8,128) tiling is exercised.
    B, S, H, C, V = 16, 256, 256, 8, 512
    TB, TS = 8, 128

    key = jax.random.PRNGKey(0)
    k_ids, k_emb, k_w, k_b = jax.random.split(key, 4)

    input_ids = jax.random.randint(k_ids, (B, S), 0, V, dtype=jnp.int32)
    attention_mask = jnp.ones((B, S), dtype=jnp.int32)
    attention_mask = attention_mask.at[0, S - 64:].set(0)    # padded tails
    attention_mask = attention_mask.at[9, S - 160:].set(0)   # ("padding=True")

    emb_table = jax.random.normal(k_emb, (V, H), dtype=jnp.float32) * 0.02
    w = jax.random.normal(k_w, (H, C), dtype=jnp.float32) * 0.02
    b = jax.random.normal(k_b, (C,), dtype=jnp.float32) * 0.02

    probs = model_wrapper_forward(input_ids, attention_mask, emb_table, w, b, tb=TB, ts=TS)
    probs = jax.block_until_ready(probs)

    # Pure-JAX reference of the same forward pass (bf16 embeddings).
    emb = emb_table.astype(jnp.bfloat16).astype(jnp.float32)[input_ids]      # (B, S, H)
    mf = attention_mask.astype(jnp.float32)
    pooled = (emb * mf[:, :, None]).sum(axis=1) / jnp.maximum(
        mf.sum(axis=1, keepdims=True), 1.0)
    expected = jax.nn.softmax(pooled @ w + b[None, :], axis=1)

    assert probs.shape == (B, C)
    assert bool(jnp.all(jnp.isfinite(probs)))
    assert bool(jnp.allclose(jnp.sum(probs, axis=1), 1.0, atol=1e-5))
    assert bool(jnp.allclose(probs, expected, atol=2e-3))

    print("KERNEL_OK")
</pallas_src>

<mosaic_0001>
module attributes {stable_mosaic.version = 11 : i64} {
  func.func @classifier_kernel(%arg0: i32, %arg1: i32, %arg2: memref<16x256xi32, #tpu.memory_space<smem>>, %arg3: memref<8x128xf32, #tpu.memory_space<vmem>>, %arg4: memref<512x128xi32, #tpu.memory_space<any>>, %arg5: memref<256x128xf32, #tpu.memory_space<vmem>>, %arg6: memref<1x128xf32, #tpu.memory_space<vmem>>, %arg7: memref<8x128xf32, #tpu.memory_space<vmem>>, %arg8: memref<2x1024x128xi32, #tpu.memory_space<vmem>>, %arg9: memref<2x!tpu.dma_semaphore, #tpu.memory_space<semaphore_mem>>, %arg10: memref<8x128xf32, #tpu.memory_space<vmem>>, %arg11: memref<8x128xf32, #tpu.memory_space<vmem>>, %arg12: memref<8x1xf32, #tpu.memory_space<vmem>>) attributes {dimension_semantics = [#tpu.dimension_semantics<parallel>, #tpu.dimension_semantics<arbitrary>], iteration_bounds = array<i64: 2, 2>, scalar_prefetch = 1 : i64, scratch_operands = 5 : i64, tpu.core_type = #tpu.core_type<tc>, window_params = [{transform_indices = @transform_0, window_bounds = array<i64: 8, 128>}, {}, {pipeline_mode = #tpu.pipeline_mode<synchronous>, transform_indices = @transform_2, window_bounds = array<i64: 256, 128>}, {pipeline_mode = #tpu.pipeline_mode<synchronous>, transform_indices = @transform_3, window_bounds = array<i64: 1, 128>}, {transform_indices = @transform_4, window_bounds = array<i64: 8, 128>}]} {
    %c8_i32 = arith.constant 8 : i32
    %0 = arith.muli %arg0, %c8_i32 : i32
    %c1_i32 = arith.constant 1 : i32
    %1 = arith.andi %arg1, %c1_i32 : i32
    %c0_i32 = arith.constant 0 : i32
    %2 = arith.cmpi eq, %arg1, %c0_i32 : i32
    %3 = arith.extui %2 : i1 to i32
    %c0_i32_0 = arith.constant 0 : i32
    %4 = arith.cmpi ne, %3, %c0_i32_0 : i32
    scf.if %4 {
      %cst_30 = arith.constant 0.000000e+00 : f32
      %59 = vector.broadcast %cst_30 : f32 to vector<8x128xf32>
      %c0_31 = arith.constant 0 : index
      %c0_32 = arith.constant 0 : index
      %60 = vector.load %arg10[%c0_31, %c0_32] : memref<8x128xf32, #tpu.memory_space<vmem>>, vector<8x128xf32>
      tpu.vector_store %arg10[%c0_31, %c0_32], %59 {strides = array<i32>} : memref<8x128xf32, #tpu.memory_space<vmem>>, vector<8x128xf32>,
      %cst_33 = arith.constant 0.000000e+00 : f32
      %61 = vector.broadcast %cst_33 : f32 to vector<8x128xf32>
      %c0_34 = arith.constant 0 : index
      %c0_35 = arith.constant 0 : index
      %62 = vector.load %arg11[%c0_34, %c0_35] : memref<8x128xf32, #tpu.memory_space<vmem>>, vector<8x128xf32>
      tpu.vector_store %arg11[%c0_34, %c0_35], %61 {strides = array<i32>} : memref<8x128xf32, #tpu.memory_space<vmem>>, vector<8x128xf32>,
      %cst_36 = arith.constant 0.000000e+00 : f32
      %63 = vector.broadcast %cst_36 : f32 to vector<8x1xf32>
      %c0_37 = arith.constant 0 : index
      %c0_38 = arith.constant 0 : index
      %64 = vector.load %arg12[%c0_37, %c0_38] : memref<8x1xf32, #tpu.memory_space<vmem>>, vector<8x1xf32>
      tpu.vector_store %arg12[%c0_37, %c0_38], %63 {strides = array<i32>} : memref<8x1xf32, #tpu.memory_space<vmem>>, vector<8x1xf32>,
    } else {
    }
    %c0_i32_1 = arith.constant 0 : i32
    %5 = arith.cmpi eq, %arg1, %c0_i32_1 : i32
    %6 = arith.extui %5 : i1 to i32
    %c0_i32_2 = arith.constant 0 : i32
    %7 = arith.cmpi ne, %6, %c0_i32_2 : i32
    scf.if %7 {
      %c0_i32_30 = arith.constant 0 : i32
      %c8_i32_31 = arith.constant 8 : i32
      %59 = arith.addi %c0_i32_30, %c8_i32_31 : i32
      %c1_i32_32 = arith.constant 1 : i32
      scf.for %arg13 = %c0_i32_30 to %59 step %c1_i32_32  : i32 {
        %c128_i32_34 = arith.constant 128 : i32
        %60 = arith.muli %arg13, %c128_i32_34 : i32
        %c0_i32_35 = arith.constant 0 : i32
        %c128_i32_36 = arith.constant 128 : i32
        %61 = arith.addi %c0_i32_35, %c128_i32_36 : i32
        %c1_i32_37 = arith.constant 1 : i32
        scf.for %arg14 = %c0_i32_35 to %61 step %c1_i32_37  : i32 {
          %62 = arith.addi %0, %arg13 : i32
          %c0_i32_39 = arith.constant 0 : i32
          %63 = arith.addi %c0_i32_39, %arg14 : i32
          %64 = arith.index_cast %62 : i32 to index
          %65 = arith.index_cast %63 : i32 to index
          %66 = memref.load %arg2[%64, %65] : memref<16x256xi32, #tpu.memory_space<smem>>
          %67 = arith.addi %60, %arg14 : i32
          %c0_i32_40 = arith.constant 0 : i32
          %c0_i32_41 = arith.constant 0 : i32
          %c0_i32_42 = arith.constant 0 : i32
          %68 = tpu.memref_slice %arg4[%66, %c0_i32_42] : memref<512x128xi32, #tpu.memory_space<any>> -> memref<1x128xi32, #tpu.memory_space<any>>
          %c0_i32_43 = arith.constant 0 : i32
          %69 = tpu.memref_slice %arg8[%c0_i32_40, %67, %c0_i32_43] : memref<2x1024x128xi32, #tpu.memory_space<vmem>> -> memref<1x1x128xi32, #tpu.memory_space<vmem>>
          %70 = tpu.memref_squeeze %69 : memref<1x1x128xi32, #tpu.memory_space<vmem>> -> memref<1x128xi32, #tpu.memory_space<vmem>>
          %71 = tpu.memref_slice %arg9[%c0_i32_41] : memref<2x!tpu.dma_semaphore, #tpu.memory_space<semaphore_mem>> -> memref<1x!tpu.dma_semaphore, #tpu.memory_space<semaphore_mem>>
          %72 = tpu.memref_squeeze %71 : memref<1x!tpu.dma_semaphore, #tpu.memory_space<semaphore_mem>> -> memref<!tpu.dma_semaphore, #tpu.memory_space<semaphore_mem>>
          tpu.enqueue_dma source(%68 : memref<1x128xi32, #tpu.memory_space<any>>) target(%70 : memref<1x128xi32, #tpu.memory_space<vmem>>) target_semaphore(%72 : memref<!tpu.dma_semaphore, #tpu.memory_space<semaphore_mem>>)
        }
        %c128_i32_38 = arith.constant 128 : i32
      }
      %c8_i32_33 = arith.constant 8 : i32
    } else {
    }
    %c1_i32_3 = arith.constant 1 : i32
    %8 = arith.addi %arg1, %c1_i32_3 : i32
    %c2_i32 = arith.constant 2 : i32
    %9 = arith.cmpi slt, %8, %c2_i32 : i32
    %10 = arith.extui %9 : i1 to i32
    %c0_i32_4 = arith.constant 0 : i32
    %11 = arith.cmpi ne, %10, %c0_i32_4 : i32
    scf.if %11 {
      %c1_i32_30 = arith.constant 1 : i32
      %59 = arith.addi %arg1, %c1_i32_30 : i32
      %c1_i32_31 = arith.constant 1 : i32
      %60 = arith.subi %c1_i32_31, %1 : i32
      %c128_i32_32 = arith.constant 128 : i32
      %61 = arith.muli %59, %c128_i32_32 : i32
      %c0_i32_33 = arith.constant 0 : i32
      %c8_i32_34 = arith.constant 8 : i32
      %62 = arith.addi %c0_i32_33, %c8_i32_34 : i32
      %c1_i32_35 = arith.constant 1 : i32
      scf.for %arg13 = %c0_i32_33 to %62 step %c1_i32_35  : i32 {
        %c128_i32_37 = arith.constant 128 : i32
        %63 = arith.muli %arg13, %c128_i32_37 : i32
        %c0_i32_38 = arith.constant 0 : i32
        %c128_i32_39 = arith.constant 128 : i32
        %64 = arith.addi %c0_i32_38, %c128_i32_39 : i32
        %c1_i32_40 = arith.constant 1 : i32
        scf.for %arg14 = %c0_i32_38 to %64 step %c1_i32_40  : i32 {
          %65 = arith.addi %0, %arg13 : i32
          %66 = arith.addi %61, %arg14 : i32
          %67 = arith.index_cast %65 : i32 to index
          %68 = arith.index_cast %66 : i32 to index
          %69 = memref.load %arg2[%67, %68] : memref<16x256xi32, #tpu.memory_space<smem>>
          %70 = arith.addi %63, %arg14 : i32
          %c0_i32_42 = arith.constant 0 : i32
          %71 = tpu.memref_slice %arg4[%69, %c0_i32_42] : memref<512x128xi32, #tpu.memory_space<any>> -> memref<1x128xi32, #tpu.memory_space<any>>
          %c0_i32_43 = arith.constant 0 : i32
          %72 = tpu.memref_slice %arg8[%60, %70, %c0_i32_43] : memref<2x1024x128xi32, #tpu.memory_space<vmem>> -> memref<1x1x128xi32, #tpu.memory_space<vmem>>
          %73 = tpu.memref_squeeze %72 : memref<1x1x128xi32, #tpu.memory_space<vmem>> -> memref<1x128xi32, #tpu.memory_space<vmem>>
          %74 = tpu.memref_slice %arg9[%60] : memref<2x!tpu.dma_semaphore, #tpu.memory_space<semaphore_mem>> -> memref<1x!tpu.dma_semaphore, #tpu.memory_space<semaphore_mem>>
          %75 = tpu.memref_squeeze %74 : memref<1x!tpu.dma_semaphore, #tpu.memory_space<semaphore_mem>> -> memref<!tpu.dma_semaphore, #tpu.memory_space<semaphore_mem>>
          tpu.enqueue_dma source(%71 : memref<1x128xi32, #tpu.memory_space<any>>) target(%73 : memref<1x128xi32, #tpu.memory_space<vmem>>) target_semaphore(%75 : memref<!tpu.dma_semaphore, #tpu.memory_space<semaphore_mem>>)
        }
        %c128_i32_41 = arith.constant 128 : i32
      }
      %c8_i32_36 = arith.constant 8 : i32
    } else {
    }
    %c0_i32_5 = arith.constant 0 : i32
    %c0_i32_6 = arith.constant 0 : i32
    %12 = tpu.memref_slice %arg8[%1, %c0_i32_5, %c0_i32_6] : memref<2x1024x128xi32, #tpu.memory_space<vmem>> -> memref<1x1024x128xi32, #tpu.memory_space<vmem>>
    %13 = tpu.memref_squeeze %12 : memref<1x1024x128xi32, #tpu.memory_space<vmem>> -> memref<1024x128xi32, #tpu.memory_space<vmem>>
    %c0_i32_7 = arith.constant 0 : i32
    %c0_i32_8 = arith.constant 0 : i32
    %14 = tpu.memref_slice %arg8[%1, %c0_i32_7, %c0_i32_8] : memref<2x1024x128xi32, #tpu.memory_space<vmem>> -> memref<1x1024x128xi32, #tpu.memory_space<vmem>>
    %15 = tpu.memref_squeeze %14 : memref<1x1024x128xi32, #tpu.memory_space<vmem>> -> memref<1024x128xi32, #tpu.memory_space<vmem>>
    %16 = tpu.memref_slice %arg9[%1] : memref<2x!tpu.dma_semaphore, #tpu.memory_space<semaphore_mem>> -> memref<1x!tpu.dma_semaphore, #tpu.memory_space<semaphore_mem>>
    %17 = tpu.memref_squeeze %16 : memref<1x!tpu.dma_semaphore, #tpu.memory_space<semaphore_mem>> -> memref<!tpu.dma_semaphore, #tpu.memory_space<semaphore_mem>>
    tpu.wait_dma2 semaphore(%17 : memref<!tpu.dma_semaphore, #tpu.memory_space<semaphore_mem>>) src(%13 : memref<1024x128xi32, #tpu.memory_space<vmem>>) dst(%15 : memref<1024x128xi32, #tpu.memory_space<vmem>>)
    %c0 = arith.constant 0 : index
    %c0_9 = arith.constant 0 : index
    %18 = vector.load %arg3[%c0, %c0_9] : memref<8x128xf32, #tpu.memory_space<vmem>>, vector<8x128xf32>
    %c0_10 = arith.constant 0 : index
    %c0_11 = arith.constant 0 : index
    %19 = vector.load %arg12[%c0_10, %c0_11] : memref<8x1xf32, #tpu.memory_space<vmem>>, vector<8x1xf32>
    %cst = arith.constant dense<0.000000e+00> : vector<8xf32>
    %20 = vector.multi_reduction <add>, %18, %cst [1] : vector<8x128xf32> to vector<8xf32>
    %21 = vector.shape_cast %20 : vector<8xf32> to vector<8x1xf32>
    %22 = arith.addf %19, %21 : vector<8x1xf32>
    %c0_12 = arith.constant 0 : index
    %c0_13 = arith.constant 0 : index
    %23 = vector.load %arg12[%c0_12, %c0_13] : memref<8x1xf32, #tpu.memory_space<vmem>>, vector<8x1xf32>
    tpu.vector_store %arg12[%c0_12, %c0_13], %22 {strides = array<i32>} : memref<8x1xf32, #tpu.memory_space<vmem>>, vector<8x1xf32>,
    %24 = arith.index_cast %1 : i32 to index
    %c0_14 = arith.constant 0 : index
    %c0_15 = arith.constant 0 : index
    %25 = vector.load %arg8[%24, %c0_14, %c0_15] : memref<2x1024x128xi32, #tpu.memory_space<vmem>>, vector<1x1024x128xi32>
    %26 = vector.shape_cast %25 : vector<1x1024x128xi32> to vector<1024x128xi32>
    %c16_i32 = arith.constant 16 : i32
    %27 = vector.broadcast %c16_i32 : i32 to vector<1024x128xi32>
    %28 = arith.shli %26, %27 : vector<1024x128xi32>
    %29 = tpu.bitcast %28 : vector<1024x128xi32> -> vector<1024x128xf32>
    %30 = arith.truncf %29 : vector<1024x128xf32> to vector<1024x128xbf16>
    %c-65536_i32 = arith.constant -65536 : i32
    %31 = vector.broadcast %c-65536_i32 : i32 to vector<1024x128xi32>
    %32 = arith.andi %26, %31 : vector<1024x128xi32>
    %33 = tpu.bitcast %32 : vector<1024x128xi32> -> vector<1024x128xf32>
    %34 = arith.truncf %33 : vector<1024x128xf32> to vector<1024x128xbf16>
    %35 = tpu.iota {dimensions = array<i32: 0>} : vector<8x1024xi32>
    %36 = tpu.iota {dimensions = array<i32: 1>} : vector<8x1024xi32>
    %c128_i32 = arith.constant 128 : i32
    %37 = vector.broadcast %c128_i32 : i32 to vector<8x1024xi32>
    %38 = arith.muli %35, %37 : vector<8x1024xi32>
    %39 = arith.cmpi sge, %36, %38 : vector<8x1024xi32>
    %c128_i32_16 = arith.constant 128 : i32
    %40 = vector.broadcast %c128_i32_16 : i32 to vector<8x1024xi32>
    %41 = arith.addi %38, %40 : vector<8x1024xi32>
    %42 = arith.cmpi slt, %36, %41 : vector<8x1024xi32>
    %43 = arith.andi %39, %42 : vector<8x1024xi1>
    %44 = tpu.concatenate %18, %18, %18, %18, %18, %18, %18, %18 in 1 : vector<8x128xf32>, vector<8x128xf32>, vector<8x128xf32>, vector<8x128xf32>, vector<8x128xf32>, vector<8x128xf32>, vector<8x128xf32>, vector<8x128xf32> -> vector<8x1024xf32>
    %cst_17 = arith.constant 0.000000e+00 : f32
    %45 = vector.broadcast %cst_17 : f32 to vector<8x1024xf32>
    %46 = arith.select %43, %44, %45 : vector<8x1024xi1>, vector<8x1024xf32>
    %47 = arith.truncf %46 : vector<8x1024xf32> to vector<8x1024xbf16>
    %c0_18 = arith.constant 0 : index
    %c0_19 = arith.constant 0 : index
    %48 = vector.load %arg10[%c0_18, %c0_19] : memref<8x128xf32, #tpu.memory_space<vmem>>, vector<8x128xf32>
    %cst_20 = arith.constant dense<0.000000e+00> : vector<8x128xf32>
    %49 = tpu.matmul %47, %30, %cst_20 {dimension_numbers = #tpu.dot_dimension_numbers<[1], [0], [0], [1], [0, 0, 1, 1], [], []>} : vector<8x1024xbf16>, vector<1024x128xbf16>, vector<8x128xf32> -> vector<8x128xf32>
    %50 = arith.addf %48, %49 : vector<8x128xf32>
    %c0_21 = arith.constant 0 : index
    %c0_22 = arith.constant 0 : index
    %51 = vector.load %arg10[%c0_21, %c0_22] : memref<8x128xf32, #tpu.memory_space<vmem>>, vector<8x128xf32>
    tpu.vector_store %arg10[%c0_21, %c0_22], %50 {strides = array<i32>} : memref<8x128xf32, #tpu.memory_space<vmem>>, vector<8x128xf32>,
    %c0_23 = arith.constant 0 : index
    %c0_24 = arith.constant 0 : index
    %52 = vector.load %arg11[%c0_23, %c0_24] : memref<8x128xf32, #tpu.memory_space<vmem>>, vector<8x128xf32>
    %cst_25 = arith.constant dense<0.000000e+00> : vector<8x128xf32>
    %53 = tpu.matmul %47, %34, %cst_25 {dimension_numbers = #tpu.dot_dimension_numbers<[1], [0], [0], [1], [0, 0, 1, 1], [], []>} : vector<8x1024xbf16>, vector<1024x128xbf16>, vector<8x128xf32> -> vector<8x128xf32>
    %54 = arith.addf %52, %53 : vector<8x128xf32>
    %c0_26 = arith.constant 0 : index
    %c0_27 = arith.constant 0 : index
    %55 = vector.load %arg11[%c0_26, %c0_27] : memref<8x128xf32, #tpu.memory_space<vmem>>, vector<8x128xf32>
    tpu.vector_store %arg11[%c0_26, %c0_27], %54 {strides = array<i32>} : memref<8x128xf32, #tpu.memory_space<vmem>>, vector<8x128xf32>,
    %c1_i32_28 = arith.constant 1 : i32
    %56 = arith.cmpi eq, %arg1, %c1_i32_28 : i32
    %57 = arith.extui %56 : i1 to i32
    %c0_i32_29 = arith.constant 0 : i32
    %58 = arith.cmpi ne, %57, %c0_i32_29 : i32
    scf.if %58 {
      %c0_30 = arith.constant 0 : index
      %c0_31 = arith.constant 0 : index
      %59 = vector.load %arg12[%c0_30, %c0_31] : memref<8x1xf32, #tpu.memory_space<vmem>>, vector<8x1xf32>
      %cst_32 = arith.constant 1.000000e+00 : f32
      %60 = vector.broadcast %cst_32 : f32 to vector<8x1xf32>
      %61 = arith.maximumf %59, %60 : vector<8x1xf32>
      %c0_33 = arith.constant 0 : index
      %c0_34 = arith.constant 0 : index
      %62 = vector.load %arg10[%c0_33, %c0_34] : memref<8x128xf32, #tpu.memory_space<vmem>>, vector<8x128xf32>
      %63 = vector.broadcast %61 : vector<8x1xf32> to vector<8x128xf32>
      %64 = arith.divf %62, %63 : vector<8x128xf32>
      %c0_35 = arith.constant 0 : index
      %c0_36 = arith.constant 0 : index
      %65 = vector.load %arg11[%c0_35, %c0_36] : memref<8x128xf32, #tpu.memory_space<vmem>>, vector<8x128xf32>
      %66 = vector.broadcast %61 : vector<8x1xf32> to vector<8x128xf32>
      %67 = arith.divf %65, %66 : vector<8x128xf32>
      %68 = tpu.concatenate %64, %67 in 1 : vector<8x128xf32>, vector<8x128xf32> -> vector<8x256xf32>
      %c0_37 = arith.constant 0 : index
      %c0_38 = arith.constant 0 : index
      %69 = vector.load %arg5[%c0_37, %c0_38] : memref<256x128xf32, #tpu.memory_space<vmem>>, vector<256x128xf32>
      %cst_39 = arith.constant dense<0.000000e+00> : vector<8x128xf32>
      %70 = tpu.matmul %68, %69, %cst_39 {dimension_numbers = #tpu.dot_dimension_numbers<[1], [0], [0], [1], [0, 0, 1, 1], [], []>} : vector<8x256xf32>, vector<256x128xf32>, vector<8x128xf32> -> vector<8x128xf32>
      %c0_40 = arith.constant 0 : index
      %c0_41 = arith.constant 0 : index
      %71 = vector.load %arg6[%c0_40, %c0_41] : memref<1x128xf32, #tpu.memory_space<vmem>>, vector<1x128xf32>
      %72 = vector.broadcast %71 : vector<1x128xf32> to vector<8x128xf32>
      %73 = arith.addf %70, %72 : vector<8x128xf32>
      %cst_42 = arith.constant dense<0xFF800000> : vector<8xf32>
      %74 = vector.multi_reduction <maximumf>, %73, %cst_42 [1] : vector<8x128xf32> to vector<8xf32>
      %75 = vector.shape_cast %74 : vector<8xf32> to vector<8x1xf32>
      %76 = vector.broadcast %75 : vector<8x1xf32> to vector<8x128xf32>
      %77 = arith.subf %73, %76 : vector<8x128xf32>
      %78 = math.exp %77 : vector<8x128xf32>
      %cst_43 = arith.constant dense<0.000000e+00> : vector<8xf32>
      %79 = vector.multi_reduction <add>, %78, %cst_43 [1] : vector<8x128xf32> to vector<8xf32>
      %80 = vector.shape_cast %79 : vector<8xf32> to vector<8x1xf32>
      %81 = vector.broadcast %80 : vector<8x1xf32> to vector<8x128xf32>
      %82 = arith.divf %78, %81 : vector<8x128xf32>
      %c0_44 = arith.constant 0 : index
      %c0_45 = arith.constant 0 : index
      %83 = vector.load %arg7[%c0_44, %c0_45] : memref<8x128xf32, #tpu.memory_space<vmem>>, vector<8x128xf32>
      tpu.vector_store %arg7[%c0_44, %c0_45], %82 {strides = array<i32>} : memref<8x128xf32, #tpu.memory_space<vmem>>, vector<8x128xf32>,
    } else {
    }
    return
  }
  func.func @transform_0(%arg0: i32, %arg1: i32, %arg2: memref<16x256xi32, #tpu.memory_space<smem>>) -> (i32, i32) {
    %c0_i32 = arith.constant 0 : i32
    return %arg0, %arg1 : i32, i32
  }
  func.func @transform_2(%arg0: i32, %arg1: i32, %arg2: memref<16x256xi32, #tpu.memory_space<smem>>) -> (i32, i32) {
    %c0_i32 = arith.constant 0 : i32
    %c0_i32_0 = arith.constant 0 : i32
    %c0_i32_1 = arith.constant 0 : i32
    return %c0_i32, %c0_i32_0 : i32, i32
  }
  func.func @transform_3(%arg0: i32, %arg1: i32, %arg2: memref<16x256xi32, #tpu.memory_space<smem>>) -> (i32, i32) {
    %c0_i32 = arith.constant 0 : i32
    %c0_i32_0 = arith.constant 0 : i32
    %c0_i32_1 = arith.constant 0 : i32
    return %c0_i32, %c0_i32_0 : i32, i32
  }
  func.func @transform_4(%arg0: i32, %arg1: i32, %arg2: memref<16x256xi32, #tpu.memory_space<smem>>) -> (i32, i32) {
    %c0_i32 = arith.constant 0 : i32
    %c0_i32_0 = arith.constant 0 : i32
    return %arg0, %c0_i32 : i32, i32
  }
}

</mosaic_0001>

<bundles_post_ra>
// kernel: tpu_custom_call.1
= control target key start
LH: loop header
LB: loop body
LE: loop exit
PB: predicated region body
PF: predicated region fallthrough
CT: control target
= control target key end

     0   :  { %s4079_s0 = inlined_call_operand.hbm [shape: s32[16,256], index: 0, kind: input, shape index: {}]   ;;  %s4080_s1 = inlined_call_operand.hbm [shape: f32[16,256], index: 1, kind: input, shape index: {}]   ;;  %s4081_s2 = inlined_call_operand.hbm [shape: u32[512,128], index: 2, kind: input, shape index: {}]   ;;  %s4082_s3 = inlined_call_operand.hbm [shape: f32[256,128], index: 3, kind: input, shape index: {}]   ;;  %s4083_s4 = inlined_call_operand.vmem [shape: f32[1,128], index: 4, kind: input, shape index: {}]   ;;  %s4084_s5 = inlined_call_operand.hbm [shape: f32[16,128], index: 5, kind: output, shape index: {}]  }
   0x1   :  { %4216 = sst [smem:[#allocation139_spill]] %s4080_s1  ;;  %s2270_s20 = scalar_lea.hbm %s4079_s0, 512 }
   0x2   :  { %4217 = sst [smem:[#allocation140_spill]] %s4081_s2  ;;  %p2271_p0 = scmp.ne.s32.totalorder %s4079_s0, %s2270_s20 }
   0x3   :  { %4218 = sst [smem:[#allocation141_spill]] %s4082_s3  ;;  %p2274_p1 = scmp.lt.u32.totalorder %s2270_s20, %s4079_s0 }
   0x4   :  { %4219 = sst [smem:[#allocation142_spill]] %s4083_s4 }
   0x5   :  { %4220 = sst [smem:[#allocation143_spill]] %s4084_s5  ;;  %p2276_p2 = pnand %p2274_p1, %p2271_p0 }
   0x7   :  { %2279 = shalt.err (!%p2276_p2)  }
   0x8   :  { %s2550_s25 = smov [#allocation8]  }
   0x9   :  { %11 = dma.hbm_to_smem %s4079_s0, 512, %s2550_s25, [#allocation7] }
   0xa   :  { %2474 = dma.done.wait [#allocation7], 512 }
   0xb   :  { %2475 = vsyncadd [#allocation7], 4294966784 }
   0xc   :  { %13 = sfence }
   0xd   :  { %14 = vsyncpa [#allocation10], 0 }
   0xe   :  { %16 = vsyncpa [#allocation10 + $0x1], 0 }
   0xf   :  { %17 = vsyncpa [#allocation13], 0 }
  0x10   :  { %18 = vsyncpa [#allocation11], 0 }
  0x11   :  { %20 = vsyncpa [#allocation11 + $0x1], 0  ;;  %s2602_s28 = smov 0   ;;  %s2604_s29 = smov 0  }
  0x12   :  { %s2606_s30 = smov 0   ;;  %s2608_s6 = smov 0  }
  0x13   :  { %s2610_s7 = smov 0   ;;  %s2612_s8 = smov 0  }
  0x14   :  { %s2614_s0 = smov 0   ;;  %s2616_s9 = smov 0  }
  0x15   :  { %s2618_s10 = smov 0   ;;  %s2620_s11 = smov 0  }
  0x16   :  { %s2622_s12 = smov 0  }
  0x17 LB: > { %4221 = sst [smem:[#allocation26_spill]] %s2492_s28  ;;  %s1784_s13 = sadd.s32 4294967295, %s2532_s12   ;;  %s2532_s12 = sphi %s2622_s12, %s26_s12   ;;  %s2528_s11 = sphi %s2620_s11, %s4535_s11   ;;  %s2524_s10 = sphi %s2618_s10, %s4534_s10   ;;  %s2520_s9 = sphi %s2616_s9, %s4533_s9   ;;  %s2516_s0 = sphi %s2614_s0, %s4532_s0   ;;  %s2512_s8 = sphi %s2612_s8, %s4531_s8   ;;  %s2508_s7 = sphi %s2610_s7, %s4530_s7   ;;  %s2504_s6 = sphi %s2608_s6, %s4529_s6   ;;  %s2500_s30 = sphi %s2606_s30, %s4528_s30   ;;  %s2496_s29 = sphi %s2604_s29, %s4537_s29   ;;  %s2492_s28 = sphi %s2602_s28, %s4536_s28  }
  0x18   : > { %4222 = sst [smem:[#allocation27_spill]] %s2500_s30  ;;  %s1785_s14 = sadd.s32 4294967294, %s2532_s12  }
  0x19   : > { %4223 = sst [smem:[#allocation28_spill]] %s2508_s7  ;;  %p60_p3 = scmp.ne.s32.totalorder %s2508_s7, %s2504_s6 }
  0x1a   : > { %4224 = sst [smem:[#allocation29_spill]] %s2512_s8  ;;  %p2658_p4 = scmp.eq.s32.totalorder %s1784_s13, 0 }
  0x1b   : > { %4225 = sst [smem:[#allocation30_spill]] %s2516_s0  ;;  %p125_p5 = scmp.ne.s32.totalorder %s2500_s30, %s2496_s29 }
  0x1c   : > { %4226 = sst [smem:[#allocation31_spill]] %s2524_s10  ;;  %p126_p6 = scmp.eq.s32.totalorder %s1784_s13, 3 }
  0x1d   : > { %4227 = sst [smem:[#allocation32_spill]] %s2528_s11  ;;  %p2666_p7 = por %p2658_p4, %p60_p3 }
  0x1e   : > { %s4228_s15 = scalar_select %p2658_p4, 1, 0 }
  0x1f   : > { %s4229_s16 = scalar_select %p2666_p7, 1, 0 }
  0x20   : > { %p131_p8 = scmp.ne.s32.totalorder %s2496_s29, %s2492_s28  ;;  %p2672_p9 = por %p126_p6, %p125_p5 }
  0x21   : > { %p132_p10 = scmp.eq.s32.totalorder %s1785_s14, 3  ;;  %p1786_p11 = scmp.ge.s32.totalorder %s2532_s12, 1 }
  0x22   : > { %s4230_s17 = scalar_select %p2672_p9, 1, 0 }
  0x23   : > { %p139_p12 = scmp.lt.s32.totalorder %s2532_s12, 5  ;;  %p2678_p13 = por %p132_p10, %p131_p8 }
  0x24   : > { %4231 = sst [smem:[#allocation33_spill]] %s4230_s17  ;;  %s2551_s20 = smov [#allocation12]  }
  0x25   : > { %s4232_s18 = scalar_select %p2678_p13, 1, 0 }
  0x26   : > { %p2682_p0 = pnand %p1786_p11, %p139_p12  ;;  %s151_s21 = sshll.u32 %s2551_s20, 4  ;;  %s152_s21 = int_to_ptr.vmem [resolvable:$true] %s151_s21 }
  0x27   : > { %4233 = sst [smem:[#allocation34_spill]] %s4232_s18  ;;  %s4236_s3 = sld [smem:[#allocation141_spill]] }
  0x28   : > { %s4234_s19 = scalar_select %p2682_p0, 1, 0 }
  0x29   : > { %p2121_p1 = pneg %p2682_p0 }
  0x2b   : > { %p2690_p2 = pnand %p2121_p1, %p2658_p4 }
  0x2d   : > { %s2280_s25 = scalar_lea.hbm %s4236_s3, 4096  ;;  %p2282_p5 = pneg %p2690_p2 }
  0x2e   : > { %p2281_p3 = scmp.ne.s32.totalorder %s4236_s3, %s2280_s25  ;;  %p2287_p10 = scmp.lt.u32.totalorder %s2280_s25, %s4236_s3 }
  0x30   : > { %p2283_p6 = pnand %p2282_p5, %p2281_p3 }
  0x32   : > { %p2284_p8 = pneg %p2283_p6 }
  0x34   : > { %p2289_p11 = pnand %p2287_p10, %p2284_p8 }
  0x36   : > { %2292 = shalt.err (!%p2289_p11)
}
  0x37   : > { %s2293_s14 = scalar_lea.vmem %s152_s21, 4096  ;;  %p2301_p9 = scmp.lt.s32.totalorder %s152_s21, %s152_s21 }
  0x38   : > { %p2294_p12 = scmp.ne.s32.totalorder %s152_s21, %s2293_s14  ;;  %p2302_p4 = scmp.lt.s32.totalorder %s2293_s14, %s2293_s14 }
  0x3a   : > { %p2296_p1 = pnand %p2294_p12, %p2282_p5  ;;  %p2303_p7 = por %p2302_p4, %p2301_p9 }
  0x3c   : > { %p2297_p13 = pneg %p2296_p1 }
  0x3e   : > { %p2304_p0 = pnand %p2303_p7, %p2297_p13 }
  0x40   : > { %2307 = shalt.err (!%p2304_p0)
}
  0x41   : > { %s2552_s20 = smov 128   ;;  %s2553_s23 = smov 8  }
  0x42   : > { %2124 = dma.hbm_to_vmem [thread:$0]  (!%p2690_p2), %s4236_s3, 4096, %s152_s21, [#allocation13], %s2552_s20, %s2552_s20, %s2553_s23  }
  0x43   : > { %s35_s26 = sadd.s32 1, %s2524_s10  ;;  %s38_s27 = sadd.s32 1, %s2528_s11 }
  0x44   : > { %p36_p4 = scmp.ge.s32.totalorder %s35_s26, 2  ;;  %s47_s6 = sadd.s32 1, %s2512_s8 }
  0x45   : > { %p54_p7 = scmp.ne.s32.totalorder %s2512_s8, %s2508_s7  ;;  %p55_p9 = scmp.eq.s32.totalorder %s2532_s12, 0 }
  0x46   : > { %s4539_s26 = smov (%p36_p4, %s35_s26), 0  ;;  %s4541_s27 = smov (!%p36_p4, %s38_s27), %s2528_s11 }
  0x47   : > { %4237 = sst [smem:[#allocation35_spill]] %s4539_s26  ;;  %s43_s22 = ssub.s32 %s2524_s10, %s4539_s26 }
  0x48   : > { %p2721_p13 = por %p55_p9, %p54_p7  ;;  %p40_p0 = scmp.ge.s32.totalorder %s4541_s27, 2 }
  0x49   : > { %s115_s21 = sadd.s32 1, %s2500_s30  ;;  %p2134_p2 = scmp.lt.s32.totalorder %s2532_s12, 4 }
  0x4a   : > { %s168_s14 = sand.u32 1, %s2512_s8   ;;  %s4543_s27 = smov (%p40_p0, %s4541_s27), 0 }
  0x4b   : > { %4239 = sst [smem:[#allocation36_spill]] %s4543_s27  ;;  %s1789_s20 = sshll.u32 %s168_s14, 3 }
  0x4c   : > { %s42_s23 = ssub.s32 %s2528_s11, %s4543_s27  ;;  %s1790_s25 = sshll.u32 %s2528_s11, 1 }
  0x4d   : > { %s44_s24 = sor.u32 %s43_s22, %s42_s23  ;;  %p113_p3 = scmp.eq.s32.totalorder %s42_s23, 0 }
  0x4e   : > { %p45_p5 = scmp.eq.s32.totalorder %s44_s24, 0  ;;  %s177_s18 = sadd.s32 %s2524_s10, %s1790_s25 }
  0x4f   : > { %s2734_s3 = scalar_select %p113_p3, %s2500_s30, %s115_s21  }
  0x50   : > { %s2737_s26 = scalar_select %p45_p5, %s2512_s8, %s47_s6  }
  0x51   : > { %4240 = sst [smem:[#allocation37_spill]] %s2734_s3  ;;  %s172_s28 = scalar_lea.vmem [#allocation9], %s1789_s20 }
  0x52   : > { %4241 = sst [smem:[#allocation38_spill]] %s2737_s26  ;;  %s181_s5 = sshll.u32 %s172_s28, 4  ;;  %s2740_s5 = int_to_ptr.vmem [resolvable:$true] %s181_s5 }
  0x53   : > { %s1791_s17 = sshll.u32 %s177_s18, 7  ;;  %s4242_s1 = sld [smem:[#allocation139_spill]] }
  0x54   : > { %p2751_p6 = pnand %p2134_p2, %p2721_p13  ;;  %s169_s28 = scalar_lea.sflag [#allocation10], %s168_s14 }
  0x56   : > { %p2310_p10 = pneg %p2751_p6 }
  0x59   : > { %s2745_s0 = scalar_lea.hbm %s4242_s1, %s1791_s17  ;;  %s2313_s17 = scalar_lea.hbm %s4242_s1, 512 }
  0x5a   : > { %s2308_s18 = scalar_lea.hbm %s2745_s0, 128  ;;  %p2314_p1 = scmp.lt.u32.totalorder %s2745_s0, %s4242_s1 }
  0x5b   : > { %p2309_p8 = scmp.ne.s32.totalorder %s2745_s0, %s2308_s18  ;;  %p2315_p4 = scmp.lt.u32.totalorder %s2313_s17, %s2308_s18 }
  0x5c   : > { %p2317_p9 = scmp.lt.u32.totalorder %s2308_s18, %s2745_s0 }
  0x5d   : > { %p2311_p11 = pnand %p2310_p10, %p2309_p8  ;;  %p2316_p7 = por %p2315_p4, %p2314_p1 }
  0x5f   : > { %p2312_p12 = pneg %p2311_p11  ;;  %p2318_p13 = por %p2317_p9, %p2316_p7 }
  0x61   : > { %p2319_p0 = pnand %p2318_p13, %p2312_p12 }
  0x63   : > { %2322 = shalt.err (!%p2319_p0)
}
  0x64   : > { %s2323_s21 = scalar_lea.vmem %s2740_s5, 128  ;;  %s2554_s14 = smov [#allocation9]  }
  0x65   : > { %p2324_p2 = scmp.ne.s32.totalorder %s2740_s5, %s2323_s21  ;;  %s2328_s20 = sshll.u32 %s2554_s14, 4  ;;  %s2329_s20 = int_to_ptr.vmem [resolvable:$false] %s2328_s20 }
  0x66   : > { %s2330_s23 = scalar_lea.vmem %s2329_s20, 256  ;;  %p2331_p8 = scmp.lt.s32.totalorder %s2740_s5, %s2329_s20 }
  0x67   : > { %p2326_p3 = pnand %p2324_p2, %p2310_p10  ;;  %p2332_p11 = scmp.lt.s32.totalorder %s2330_s23, %s2323_s21 }
  0x69   : > { %p2327_p5 = pneg %p2326_p3  ;;  %p2333_p1 = por %p2332_p11, %p2331_p8 }
  0x6b   : > { %p2334_p4 = pnand %p2333_p1, %p2327_p5 }
  0x6d   : > { %2337 = shalt.err (!%p2334_p4)
}
  0x6e   : > { %2128 = dma.hbm_to_vmem [thread:$0]  (!%p2751_p6), %s2745_s0, 128, %s2740_s5, %s169_s28  }
  0x6f   : > { %p4244_p12 = scmp.ne.s32.totalorder %s4234_s19, 0 }
  0x71   : > { %190 = sbr.rel (%p4244_p12) target bundleno = 1212 (0x4bc), region = 32 }
  0x78   : > { %s192_s24 = sand.u32 1, %s2508_s7   ;;  %p4245_p10 = scmp.ne.s32.totalorder %s4229_s16, 0 }
  0x79   : > { %s2783_s25 = sshll.u32 %s192_s24, 3  ;;  %s193_s18 = scalar_lea.sflag [#allocation10], %s192_s24 }
  0x7a   : > { %2477 = dma.done.wait (%p4245_p10), %s193_s18, 128  }
  0x7b   : > { %2479 = vsyncadd (%p4245_p10), %s193_s18, 4294967168  ;;  %p4246_p7 = scmp.ne.s32.totalorder %s4228_s15, 0 }
  0x7d   : > { %2481 = dma.done.wait (%p4246_p7), [#allocation13], 4096  }
  0x7e   : > { %2483 = vsyncadd (%p4246_p7), [#allocation13], 4294963200  ;;  %s4247_s5 = sld [smem:[#allocation30_spill]]  ;;  %s4099_s0 = sand.u32 1, %s2496_s29  }
  0x7f   : > { %s2798_s6 = sshll.u32 %s4099_s0, 3 }
  0x84   : > { %s2801_s28 = sand.u32 1, %s4247_s5  ;;  %p1797_p6 = scmp.ne.s32.totalorder %s4247_s5, 0 }
  0x85   : > { %vm232_vm0 = vcmask (!%p1797_p6), 7168   ;;  %v2555_v0 = vmov (!%p1797_p6), 0.0   ;;  %s2805_s15 = smov (!%p1797_p6), 0  }
  0x86   : > { %229 = sbr.rel (%p1797_p6) target bundleno = 195 (0xc3), region = 44  ;;  %230 = vst [vmem:[#allocation4] sm:$0xff] (!%p1797_p6), %v2555_v0  ;;  %231 = vst [vmem:[#allocation5] sm:$0xff] (!%p1797_p6), %v2555_v0 }
  0x87   : > { %233 = vst.msk [vmem:[#allocation6] sm:$0xff] (!%p1797_p6), %vm232_vm0, %v2555_v0 }
  0x8d LB: >> { %s1798_s4 = sshll.u32 %s2536_s15, 7  ;;  %s2811_s17 = smov 0   ;;  %s2536_s15 = sphi %s2805_s15, %s239_s15  }
  0x8e LB: >>> { %s4248_s19 = sshll.u32 %s2520_s9, 3  ;;  %s248_s21 = sshra.s32 %s2540_s17, 7  ;;  %s2540_s17 = sphi %s2811_s17, %s246_s17  }
  0x8f   : >>> { %s247_s22 = sadd.s32 %s2536_s15, %s4248_s19  ;;  %s258_s18 = sand.u32 127, %s2540_s17 }
  0x90   : >>> { %s250_s13 = sshra.s32 %s247_s22, 3  ;;  %s256_s23 = sand.u32 7, %s247_s22 }
  0x91   : >>> { %s1799_s14 = sshll.u32 %s250_s13, 1  ;;  %s1801_s5 = sshll.u32 %s256_s23, 7 }
  0x92   : >>> { %s253_s20 = sadd.s32 %s1799_s14, %s248_s21  ;;  %s263_s0 = sadd.s32 %s2540_s17, %s1798_s4 }
  0x93   : >>> { %s1800_s24 = sshll.u32 %s253_s20, 10  ;;  %s260_s16 = sadd.s32 %s1801_s5, %s258_s18 }
  0x94   : >>> { %s261_s2 = sadd.s32 %s1800_s24, %s260_s16  ;;  %s266_s27 = scalar_lea.vmem [#allocation2], %s263_s0 }
  0x95   : >>> { %s262_s1 = sld [smem:[#allocation8 + %s261_s2]]  ;;  %s274_s11 = sshll.u32 %s266_s27, 4  ;;  %s275_s11 = int_to_ptr.vmem [resolvable:$true] %s274_s11 }
  0x96   : >>> { %s4249_s19 = sld [smem:[#allocation140_spill]] }
  0x9b   : >>> { %s1802_s10 = sshll.u32 %s262_s1, 4 }
  0x9c   : >>> { %s265_s7 = scalar_lea.hbm %s4249_s19, %s1802_s10  ;;  %s2340_s21 = scalar_lea.hbm %s4249_s19, 8192 }
  0x9d   : >>> { %s2338_s3 = scalar_lea.hbm %s265_s7, 16  ;;  %p2341_p13 = scmp.lt.u32.totalorder %s265_s7, %s4249_s19 }
  0x9e   : >>> { %p2339_p9 = scmp.ne.s32.totalorder %s265_s7, %s2338_s3  ;;  %p2342_p0 = scmp.lt.u32.totalorder %s2340_s21, %s2338_s3 }
  0x9f   : >>> { %p2344_p3 = scmp.lt.u32.totalorder %s2338_s3, %s265_s7 }
  0xa0   : >>> { %p2343_p2 = por %p2342_p0, %p2341_p13 }
  0xa2   : >>> { %p2345_p5 = por %p2344_p3, %p2343_p2 }
  0xa4   : >>> { %p2346_p8 = pnand %p2345_p5, %p2339_p9 }
  0xa6   : >>> { %2349 = shalt.err (!%p2346_p8)  }
  0xa7   : >>> { %s2350_s1 = scalar_lea.vmem %s275_s11, 16  ;;  %s2556_s8 = smov [#allocation2]  }
  0xa8   : >>> { %p2351_p11 = scmp.ne.s32.totalorder %s275_s11, %s2350_s1  ;;  %s2352_s10 = sshll.u32 %s2556_s8, 4  ;;  %s2353_s10 = int_to_ptr.vmem [resolvable:$false] %s2352_s10 }
  0xa9   : >>> { %s2354_s26 = scalar_lea.vmem %s2353_s10, 32768  ;;  %p2355_p1 = scmp.lt.s32.totalorder %s275_s11, %s2353_s10 }
  0xaa   : >>> { %p2356_p4 = scmp.lt.s32.totalorder %s2354_s26, %s2350_s1 }
  0xac   : >>> { %p2357_p12 = por %p2356_p4, %p2355_p1 }
  0xae   : >>> { %p2358_p10 = pnand %p2357_p12, %p2351_p11 }
  0xb0   : >>> { %2361 = shalt.err (!%p2358_p10)  }
  0xb1   : >>> { %277 = dma.hbm_to_vmem [thread:$0]  %s265_s7, 16, %s275_s11, [#allocation3] }
  0xb2   : >>> { %s246_s17 = sadd.s32 1, %s2540_s17  }
  0xb3   : >>> { %p243_p7 = scmp.ge.s32.totalorder %s246_s17, 128  }
  0xb4   : >> { %s239_s15 = sadd.s32 (%p243_p7), 1, %s2536_s15  }
  0xb5   : >> { %245 = sbr.rel (!%p243_p7) target bundleno = 142 (0x8e), region = 137  ;;  %p236_p6 = scmp.ge.s32.totalorder (%p243_p7), %s239_s15, 8  }
  0xbc   : > { %238 = sbr.rel (!%p236_p6) target bundleno = 141 (0x8d), region = 148 }
  0xc3 PF: > { %s4250_s3 = sld [smem:[#allocation30_spill]] }
  0xc9   : > { %s278_s27 = sadd.s32 1, %s4250_s3 }
  0xca   : > { %p1803_p9 = scmp.ge.s32.totalorder %s278_s27, 2 }
  0xcb   : > { %s4251_s2 = sld [smem:[#allocation30_spill]] (!%p1803_p9)  ;;  %s283_s7 = ssub.s32 (!%p1803_p9), 1, %s2801_s28 }
  0xcc   : > { %282 = sbr.rel (%p1803_p9) target bundleno = 270 (0x10e), region = 66  ;;  %s2844_s19 = smov (!%p1803_p9), 0  }
  0xd1   : > { %s1868_s11 = sshll.u32 (!%p1803_p9), %s4251_s2, 7 }
  0xd2   : > { %s2842_s0 = sadd.s32 (!%p1803_p9), 128, %s1868_s11 }
  0xd3   : > { %4252 = sst [smem:[#allocation39_spill]] %s2842_s0 }
  0xd4 LB: >> { %s1805_s16 = sshll.u32 %s2544_s19, 7  ;;  %s2850_s15 = smov 0   ;;  %s2544_s19 = sphi %s2844_s19, %s290_s19  }
  0xd5 LB: >>> { %s4253_s0 = sld [smem:[#allocation39_spill]]  ;;  %s4254_s4 = sshll.u32 %s2520_s9, 3  ;;  %s2548_s15 = sphi %s2850_s15, %s297_s15  }
  0xd6   : >>> { %s298_s17 = sadd.s32 %s2544_s19, %s4254_s4  ;;  %s315_s8 = sadd.s32 %s2548_s15, %s1805_s16 }
  0xd7   : >>> { %s302_s23 = sshra.s32 %s298_s17, 3  ;;  %s308_s13 = sand.u32 7, %s298_s17 }
  0xd8   : >>> { %s1806_s18 = sshll.u32 %s302_s23, 1  ;;  %s1808_s20 = sshll.u32 %s308_s13, 7 }
  0xd9   : >>> { %s1810_s26 = sshll.u32 %s283_s7, 10  ;;  %s4255_s17 = sld [smem:[#allocation140_spill]] }
  0xda   : >>> { %s319_s27 = sadd.s32 %s1810_s26, %s315_s8 }
  0xdb   : >>> { %s299_s24 = sadd.s32 %s2548_s15, %s4253_s0  ;;  %s320_s2 = scalar_lea.vmem [#allocation2], %s319_s27 }
  0xdc   : >>> { %s300_s5 = sshra.s32 %s299_s24, 7  ;;  %s310_s21 = sand.u32 127, %s299_s24 }
  0xdd   : >>> { %s305_s22 = sadd.s32 %s1806_s18, %s300_s5  ;;  %s312_s1 = sadd.s32 %s1808_s20, %s310_s21 }
  0xde   : >>> { %s1807_s14 = sshll.u32 %s305_s22, 10  ;;  %s329_s11 = sshll.u32 %s320_s2, 4  ;;  %s330_s11 = int_to_ptr.vmem [resolvable:$true] %s329_s11 }
  0xdf   : >>> { %s313_s10 = sadd.s32 %s1807_s14, %s312_s1  ;;  %s321_s24 = scalar_lea.sflag [#allocation3], %s283_s7 }
  0xe0   : >>> { %s314_s3 = sld [smem:[#allocation8 + %s313_s10]]  ;;  %s2364_s22 = scalar_lea.hbm %s4255_s17, 8192 }
  0xe6   : >>> { %s1809_s4 = sshll.u32 %s314_s3, 4 }
  0xe7   : >>> { %s317_s30 = scalar_lea.hbm %s4255_s17, %s1809_s4 }
  0xe8   : >>> { %s2362_s18 = scalar_lea.hbm %s317_s30, 16  ;;  %p2365_p0 = scmp.lt.u32.totalorder %s317_s30, %s4255_s17 }
  0xe9   : >>> { %p2363_p13 = scmp.ne.s32.totalorder %s317_s30, %s2362_s18  ;;  %p2366_p2 = scmp.lt.u32.totalorder %s2364_s22, %s2362_s18 }
  0xea   : >>> { %p2368_p5 = scmp.lt.u32.totalorder %s2362_s18, %s317_s30 }
  0xeb   : >>> { %p2367_p3 = por %p2366_p2, %p2365_p0 }
  0xed   : >>> { %p2369_p8 = por %p2368_p5, %p2367_p3 }
  0xef   : >>> { %p2370_p11 = pnand %p2369_p8, %p2363_p13 }
  0xf1   : >>> { %2373 = shalt.err (!%p2370_p11)  }
  0xf2   : >>> { %s2374_s0 = scalar_lea.vmem %s330_s11, 16  ;;  %s2557_s20 = smov [#allocation2]  }
  0xf3   : >>> { %p2375_p1 = scmp.ne.s32.totalorder %s330_s11, %s2374_s0  ;;  %s2376_s1 = sshll.u32 %s2557_s20, 4  ;;  %s2377_s1 = int_to_ptr.vmem [resolvable:$false] %s2376_s1 }
  0xf4   : >>> { %s2378_s8 = scalar_lea.vmem %s2377_s1, 32768  ;;  %p2379_p4 = scmp.lt.s32.totalorder %s330_s11, %s2377_s1 }
  0xf5   : >>> { %p2380_p12 = scmp.lt.s32.totalorder %s2378_s8, %s2374_s0 }
  0xf7   : >>> { %p2381_p10 = por %p2380_p12, %p2379_p4 }
  0xf9   : >>> { %p2382_p7 = pnand %p2381_p10, %p2375_p1 }
  0xfb   : >>> { %2385 = shalt.err (!%p2382_p7)  }
  0xfc   : >>> { %332 = dma.hbm_to_vmem [thread:$0]  %s317_s30, 16, %s330_s11, %s321_s24 }
  0xfd   : >>> { %s297_s15 = sadd.s32 1, %s2548_s15  }
  0xfe   : >>> { %p294_p6 = scmp.ge.s32.totalorder %s297_s15, 128  }
  0xff   : >> { %s290_s19 = sadd.s32 (%p294_p6), 1, %s2544_s19  }
 0x100   : >> { %296 = sbr.rel (!%p294_p6) target bundleno = 213 (0xd5), region = 159  ;;  %p287_p9 = scmp.ge.s32.totalorder (%p294_p6), %s290_s19, 8  }
 0x107   : > { %289 = sbr.rel (!%p287_p9) target bundleno = 212 (0xd4), region = 170 }
 0x10e PF: > { %s1811_s10 = sshll.u32 %s2801_s28, 10  ;;  %s335_s3 = scalar_lea.sflag [#allocation3], %s2801_s28 }
 0x10f   : > { %s2883_s26 = scalar_lea.vmem [#allocation2], %s1811_s10 }
 0x110   : > { %2484 = dma.done.wait %s335_s3, 16384 }
 0x111   : > { %2485 = vsyncadd %s335_s3, 4294950912  ;;  %v1114_v1 = vlaneseq  ;;  %v2906_v10 = vld [vmem:[%s2883_s26 + $0x80] sm:$0xff]  ;;  %v2909_v11 = vld [vmem:[%s2883_s26 + $0x88] sm:$0xff]  ;;  %s4283_s30 = scalar_lea.vmem [#allocation9], %s2783_s25  ;;  %s4516_s25 = sld [smem:[#allocation30_spill]] }
 0x112   : > { %v2912_v12 = vld [vmem:[%s2883_s26 + $0x180] sm:$0xff]  ;;  %v490_v16 = vshll.u32 %v2906_v10, 16  ;;  %v491_v17 = vshll.u32 %v2909_v11, 16  ;;  %v2928_v20 = vld [vmem:[%s2883_s26 + $0x188] sm:$0xff]  ;;  %v2950_v33 = vld [vmem:[%s2883_s26 + $0x90] sm:$0xff] }
 0x113   : > { %v1115_v2 = vshrl.u32 %v1114_v1, 7  ;;  %v2886_v3 = vand.u32 127, %v1114_v1  ;;  %v2931_v21 = vld [vmem:[%s2883_s26] sm:$0xff]  ;;  %v522_v22 = vshll.u32 %v2912_v12, 16  ;;  %v523_v23 = vshll.u32 %v2928_v20, 16  ;;  %v2938_v26 = vld [vmem:[%s2883_s26 + $0x8] sm:$0xff] }
 0x114   : > { %v2941_v27 = vld [vmem:[%s2883_s26 + $0x100] sm:$0xff]  ;;  %v738_v28 = vpack.c.bf16 %v491_v17, %v490_v16  ;;  %v474_v29 = vshll.u32 %v2931_v21, 16  ;;  %v475_v30 = vshll.u32 %v2938_v26, 16  ;;  %v2947_v32 = vld [vmem:[%s2883_s26 + $0x108] sm:$0xff]  ;;  %v2953_v34 = vld [vmem:[%s2883_s26 + $0x98] sm:$0xff]  ;;  %v492_v45 = vshll.u32 %v2950_v33, 16 }
 0x115   : > { %v2888_v4 = vmul.u32 128, %v1115_v2  ;;  %v2891_v5 = vadd.s32 128, %v2886_v3  ;;  %v2894_v6 = vadd.s32 384, %v2886_v3  ;;  %v2897_v7 = vadd.s32 256, %v2886_v3  ;;  %v2959_v39 = vld [vmem:[%s2883_s26 + $0x190] sm:$0xff]  ;;  %v2962_v40 = vld [vmem:[%s2883_s26 + $0x198] sm:$0xff] }
 0x116   : > { %v2900_v8 = vadd.s32 640, %v2886_v3  ;;  %v2903_v9 = vadd.s32 896, %v2886_v3  ;;  %v2918_v14 = vadd.s32 512, %v2886_v3  ;;  %v2921_v15 = vadd.s32 768, %v2886_v3  ;;  %v2965_v41 = vld [vmem:[%s2883_s26 + $0x10] sm:$0xff]  ;;  %1870 = vmatprep.subr.bf16.mxu0 %v738_v28  ;;  %v2971_v46 = vld [vmem:[%s2883_s26 + $0x18] sm:$0xff] }
 0x117   : > { %v2915_v13 = vadd.s32 128, %v2888_v4  ;;  %v754_v35 = vpack.c.bf16 %v523_v23, %v522_v22  ;;  %v506_v37 = vshll.u32 %v2941_v27, 16  ;;  %v507_v38 = vshll.u32 %v2947_v32, 16  ;;  %v2974_v47 = vld [vmem:[%s2883_s26 + $0x110] sm:$0xff]  ;;  %v2977_v48 = vld [vmem:[%s2883_s26 + $0x118] sm:$0xff]  ;;  %v2983_v53 = vld [vmem:[%s2883_s26 + $0xa0] sm:$0xff] }
 0x118   : > { %v730_v42 = vpack.c.bf16 %v475_v30, %v474_v29  ;;  %v493_v50 = vshll.u32 %v2953_v34, 16  ;;  %v524_v51 = vshll.u32 %v2959_v39, 16  ;;  %v525_v52 = vshll.u32 %v2962_v40, 16  ;;  %v2986_v54 = vld [vmem:[%s2883_s26 + $0xa8] sm:$0xff]  ;;  %v2993_v59 = vld [vmem:[%s2883_s26 + $0x1a0] sm:$0xff]  ;;  %v3040_v22 = vld [vmem:[%s2883_s26 + $0x38] sm:$0xff] }
 0x119   : > { %1892 = vmatprep.subr.bf16.mxu1 %v754_v35  ;;  %v746_v49 = vpack.c.bf16 %v507_v38, %v506_v37  ;;  %v476_v55 = vshll.u32 %v2965_v41, 16  ;;  %v477_v56 = vshll.u32 %v2971_v46, 16  ;;  %v2996_v60 = vld [vmem:[%s2883_s26 + $0x1a8] sm:$0xff]  ;;  %v508_v63 = vshll.u32 %v2974_v47, 16  ;;  %v3001_v1 = vld [vmem:[%s2883_s26 + $0x20] sm:$0xff]  ;;  %4260 = vst [vmem:[#allocation44_spill] sm:$0xff] %v3040_v22 }
 0x11a   : > { %1871 = vmatpush3.bf16.msra.mxu0 %v730_v42  ;;  %v739_v61 = vpack.c.bf16 %v493_v50, %v492_v45  ;;  %v755_v62 = vpack.c.bf16 %v525_v52, %v524_v51  ;;  %v509_v0 = vshll.u32 %v2977_v48, 16  ;;  %v3004_v2 = vld [vmem:[%s2883_s26 + $0x28] sm:$0xff]  ;;  %v494_v23 = vshll.u32 %v2983_v53, 16  ;;  %v3010_v28 = vld [vmem:[%s2883_s26 + $0x120] sm:$0xff]  ;;  %v3019_v42 = vld [vmem:[%s2883_s26 + $0xb0] sm:$0xff]  ;;  %p1860_p13 = scmp.ne.s32.totalorder %s4516_s25, 1 }
 0x11b   : > { %1893 = vmatpush3.bf16.msra.mxu1 %v746_v49  ;;  %v731_v16 = vpack.c.bf16 %v477_v56, %v476_v55  ;;  %v3013_v29 = vld [vmem:[%s2883_s26 + $0x128] sm:$0xff]  ;;  %v495_v35 = vshll.u32 %v2986_v54, 16  ;;  %v526_v37 = vshll.u32 %v2993_v59, 16  ;;  %v527_v38 = vshll.u32 %v2996_v60, 16  ;;  %v3022_v45 = vld [vmem:[%s2883_s26 + $0xb8] sm:$0xff]  ;;  %v3029_v55 = vld [vmem:[%s2883_s26 + $0x1b0] sm:$0xff] }
 0x11c   : > { %1872 = vmatprep.subr.bf16.mxu0 %v739_v61  ;;  %1894 = vmatprep.subr.bf16.mxu1 %v755_v62  ;;  %v747_v30 = vpack.c.bf16 %v509_v0, %v508_v63  ;;  %4256 = vst [vmem:[#allocation40_spill] sm:$0xff] %v3022_v45  ;;  %v478_v49 = vshll.u32 %v3001_v1, 16  ;;  %v479_v50 = vshll.u32 %v3004_v2, 16  ;;  %4257 = vst [vmem:[#allocation41_spill] sm:$0xff] %v3029_v55  ;;  %v3032_v56 = vld [vmem:[%s2883_s26 + $0x1b8] sm:$0xff]  ;;  %v510_v63 = vshll.u32 %v3010_v28, 16 }
 0x11d   : > { %4258 = vst [vmem:[#allocation42_spill] sm:$0xff] %v3032_v56  ;;  %v740_v61 = vpack.c.bf16 %v495_v35, %v494_v23  ;;  %v756_v62 = vpack.c.bf16 %v527_v38, %v526_v37  ;;  %v511_v0 = vshll.u32 %v3013_v29, 16  ;;  %v496_v58 = vshll.u32 %v3019_v42, 16  ;;  %v3046_v23 = vld [vmem:[%s2883_s26 + $0x130] sm:$0xff]  ;;  %v3058_v17 = vld [vmem:[%s2883_s26 + $0xc8] sm:$0xff]  ;;  %v3073_v31 = vld [vmem:[%s2883_s26 + $0x40] sm:$0xff] }
 0x11e   : > { %1873 = vmatpush3.bf16.msra.mxu0 %v731_v16  ;;  %v3037_v16 = vld [vmem:[%s2883_s26 + $0x30] sm:$0xff]  ;;  %v732_v51 = vpack.c.bf16 %v479_v50, %v478_v49  ;;  %4261 = vst [vmem:[#allocation45_spill] sm:$0xff] %v3046_v23  ;;  %v497_v37 = vshll.u32 %v3022_v45, 16  ;;  %v528_v38 = vshll.u32 %v3029_v55, 16  ;;  %v529_v49 = vshll.u32 %v3032_v56, 16  ;;  %v3055_v50 = vld [vmem:[%s2883_s26 + $0xc0] sm:$0xff] }
 0x11f   : > { %1895 = vmatpush3.bf16.msra.mxu1 %v747_v30  ;;  %4259 = vst [vmem:[#allocation43_spill] sm:$0xff] %v3037_v16  ;;  %v3049_v30 = vld [vmem:[%s2883_s26 + $0x138] sm:$0xff]  ;;  %1874 = vmatprep.subr.bf16.mxu0 %v740_v61  ;;  %v748_v35 = vpack.c.bf16 %v511_v0, %v510_v63  ;;  %4263 = vst [vmem:[#allocation47_spill] sm:$0xff] %v3055_v50  ;;  %v480_v52 = vshll.u32 %v3037_v16, 16  ;;  %v481_v57 = vshll.u32 %v3040_v22, 16  ;;  %v3065_v63 = vld [vmem:[%s2883_s26 + $0x1c0] sm:$0xff] }
 0x120   : > { %4262 = vst [vmem:[#allocation46_spill] sm:$0xff] %v3049_v30  ;;  %1896 = vmatprep.subr.bf16.mxu1 %v756_v62  ;;  %4264 = vst [vmem:[#allocation48_spill] sm:$0xff] %v3058_v17  ;;  %v3068_v0 = vld [vmem:[%s2883_s26 + $0x1c8] sm:$0xff]  ;;  %v741_v44 = vpack.c.bf16 %v497_v37, %v496_v58  ;;  %v757_v43 = vpack.c.bf16 %v529_v49, %v528_v38  ;;  %v512_v36 = vshll.u32 %v3046_v23, 16  ;;  %v498_v19 = vshll.u32 %v3055_v50, 16  ;;  %v3082_v58 = vld [vmem:[%s2883_s26 + $0x140] sm:$0xff] }
 0x121   : > { %4265 = vst [vmem:[#allocation49_spill] sm:$0xff] %v3065_v63  ;;  %4266 = vst [vmem:[#allocation50_spill] sm:$0xff] %v3068_v0  ;;  %v3076_v25 = vld [vmem:[%s2883_s26 + $0x48] sm:$0xff]  ;;  %v733_v61 = vpack.c.bf16 %v481_v57, %v480_v52  ;;  %v499_v38 = vshll.u32 %v3058_v17, 16  ;;  %v530_v49 = vshll.u32 %v3065_v63, 16  ;;  %v531_v57 = vshll.u32 %v3068_v0, 16 }
 0x122   : > { %1875 = vmatpush3.bf16.msra.mxu0 %v732_v51  ;;  %v513_v51 = vshll.u32 %v3049_v30, 16  ;;  %4267 = vst [vmem:[#allocation51_spill] sm:$0xff] %v3073_v31  ;;  %4268 = vst [vmem:[#allocation52_spill] sm:$0xff] %v3076_v25  ;;  %v3091_v52 = vld [vmem:[%s2883_s26 + $0xd0] sm:$0xff]  ;;  %v3094_v24 = vld [vmem:[%s2883_s26 + $0xd8] sm:$0xff]  ;;  %v482_v62 = vshll.u32 %v3073_v31, 16  ;;  %vm1127_vm1 = vcmp.ge.s32.totalorder %v2891_v5, %v2888_v4  ;;  %vm1129_vm2 = vcmp.ge.s32.totalorder %v2894_v6, %v2888_v4 }
 0x123   : > { %1897 = vmatpush3.bf16.msra.mxu1 %v748_v35  ;;  %4269 = vst [vmem:[#allocation53_spill] sm:$0xff] %v3082_v58  ;;  %v3085_v35 = vld [vmem:[%s2883_s26 + $0x148] sm:$0xff]  ;;  %1876 = vmatprep.subr.bf16.mxu0 %v741_v44  ;;  %4271 = vst [vmem:[#allocation55_spill] sm:$0xff] %v3091_v52  ;;  %v483_v18 = vshll.u32 %v3076_v25, 16  ;;  %v3101_v44 = vld [vmem:[%s2883_s26 + $0x1d0] sm:$0xff]  ;;  %v742_v0 = vpack.c.bf16 %v499_v38, %v498_v19  ;;  %v758_v63 = vpack.c.bf16 %v531_v57, %v530_v49  ;;  %s4517_s19 = sld [smem:[#allocation142_spill]] (!%p1860_p13) }
 0x124   : > { %4270 = vst [vmem:[#allocation54_spill] sm:$0xff] %v3085_v35  ;;  %1898 = vmatprep.subr.bf16.mxu1 %v757_v43  ;;  %v749_v37 = vpack.c.bf16 %v513_v51, %v512_v36  ;;  %4272 = vst [vmem:[#allocation56_spill] sm:$0xff] %v3094_v24  ;;  %v3104_v51 = vld [vmem:[%s2883_s26 + $0x1d8] sm:$0xff]  ;;  %v514_v17 = vshll.u32 %v3082_v58, 16  ;;  %v3109_v50 = vld [vmem:[%s2883_s26 + $0x50] sm:$0xff]  ;;  %v501_v57 = vshll.u32 %v3094_v24, 16  ;;  %vm1126_vm3 = vcmp.ge.s32.totalorder %v2886_v3, %v2888_v4 }
 0x125   : > { %4273 = vst [vmem:[#allocation57_spill] sm:$0xff] %v3101_v44  ;;  %4274 = vst [vmem:[#allocation58_spill] sm:$0xff] %v3104_v51  ;;  %v3112_v36 = vld [vmem:[%s2883_s26 + $0x58] sm:$0xff]  ;;  %v734_v31 = vpack.c.bf16 %v483_v18, %v482_v62  ;;  %v3118_v19 = vld [vmem:[%s2883_s26 + $0x150] sm:$0xff]  ;;  %v532_v30 = vshll.u32 %v3101_v44, 16  ;;  %v533_v18 = vshll.u32 %v3104_v51, 16  ;;  %vm1128_vm4 = vcmp.ge.s32.totalorder %v2897_v7, %v2888_v4 }
 0x126   : > { %1877 = vmatpush3.bf16.msra.mxu0 %v733_v61  ;;  %v515_v61 = vshll.u32 %v3085_v35, 16  ;;  %4275 = vst [vmem:[#allocation59_spill] sm:$0xff] %v3109_v50  ;;  %4276 = vst [vmem:[#allocation60_spill] sm:$0xff] %v3112_v36  ;;  %v3121_v38 = vld [vmem:[%s2883_s26 + $0x158] sm:$0xff]  ;;  %v3127_v62 = vld [vmem:[%s2883_s26 + $0xe0] sm:$0xff]  ;;  %v516_v24 = vshll.u32 %v3118_v19, 16  ;;  %vm1136_vm5 = vcmp.lt.s32.totalorder %v2891_v5, %v2915_v13  ;;  %vm1138_vm7 = vcmp.lt.s32.totalorder %v2894_v6, %v2915_v13 }
 0x127   : > { %1899 = vmatpush3.bf16.msra.mxu1 %v749_v37  ;;  %v500_v37 = vshll.u32 %v3091_v52, 16  ;;  %4277 = vst [vmem:[#allocation61_spill] sm:$0xff] %v3118_v19  ;;  %4278 = vst [vmem:[#allocation62_spill] sm:$0xff] %v3121_v38  ;;  %1878 = vmatprep.subr.bf16.mxu0 %v742_v0  ;;  %v3130_v25 = vld [vmem:[%s2883_s26 + $0xe8] sm:$0xff]  ;;  %v3133_v43 = vld [vmem:[%s2883_s26 + $0x1e0] sm:$0xff]  ;;  %v484_v52 = vshll.u32 %v3109_v50, 16  ;;  %v759_v44 = vpack.c.bf16 %v533_v18, %v532_v30 }
 0x128   : > { %1900 = vmatprep.subr.bf16.mxu1 %v758_v63  ;;  %v750_v49 = vpack.c.bf16 %v515_v61, %v514_v17  ;;  %4279 = vst [vmem:[#allocation63_spill] sm:$0xff] %v3127_v62  ;;  %4280 = vst [vmem:[#allocation64_spill] sm:$0xff] %v3130_v25  ;;  %v485_v63 = vshll.u32 %v3112_v36, 16  ;;  %v3140_v61 = vld [vmem:[%s2883_s26 + $0x1e8] sm:$0xff]  ;;  %v3144_v51 = vld [vmem:[%s4283_s30] sm:$0xff]  ;;  %v517_v35 = vshll.u32 %v3121_v38, 16  ;;  %vm1135_vm9 = vcmp.lt.s32.totalorder %v2886_v3, %v2915_v13 }
 0x129   : > { %4281 = vst [vmem:[#allocation65_spill] sm:$0xff] %v3133_v43  ;;  %4282 = vst [vmem:[#allocation66_spill] sm:$0xff] %v3140_v61  ;;  %v3151_v17 = vld [vmem:[%s2883_s26 + $0x60] sm:$0xff]  ;;  %v3154_v0 = vld [vmem:[%s2883_s26 + $0x68] sm:$0xff]  ;;  %341 = vadd.xlane.f32.xlu0 %v3144_v51  ;;  %v534_v18 = vshll.u32 %v3133_v43, 16  ;;  %vm1137_vm10 = vcmp.lt.s32.totalorder %v2897_v7, %v2915_v13  ;;  %s4518_s16 = scalar_lea.vmem (!%p1860_p13), [#allocation14], %s2798_s6 }
 0x12a   : > { %1879 = vmatpush3.bf16.msra.mxu0 %v734_v31  ;;  %v743_v31 = vpack.c.bf16 %v501_v57, %v500_v37  ;;  %4284 = vst [vmem:[#allocation67_spill] sm:$0xff] %v3151_v17  ;;  %4285 = vst [vmem:[#allocation68_spill] sm:$0xff] %v3154_v0  ;;  %v735_v36 = vpack.c.bf16 %v485_v63, %v484_v52  ;;  %v502_v37 = vshll.u32 %v3127_v62, 16  ;;  %v3161_v30 = vld [vmem:[%s2883_s26 + $0x160] sm:$0xff]  ;;  %v503_v52 = vshll.u32 %v3130_v25, 16  ;;  %v3172_v58 = vld [vmem:[%s2883_s26 + $0xf0] sm:$0xff] }
 0x12b   : > { %1901 = vmatpush3.bf16.msra.mxu1 %v750_v49  ;;  %4286 = vst [vmem:[#allocation69_spill] sm:$0xff] %v3161_v30  ;;  %v3164_v49 = vld [vmem:[%s2883_s26 + $0x168] sm:$0xff]  ;;  %v751_v57 = vpack.c.bf16 %v517_v35, %v516_v24  ;;  %v535_v63 = vshll.u32 %v3140_v61, 16  ;;  %4288 = vst [vmem:[#allocation71_spill] sm:$0xff] %v3172_v58  ;;  %v3175_v50 = vld [vmem:[%s2883_s26 + $0xf8] sm:$0xff]  ;;  %v486_v62 = vshll.u32 %v3151_v17, 16 }
 0x12c   : > { %4287 = vst [vmem:[#allocation70_spill] sm:$0xff] %v3164_v49  ;;  %1880 = vmatprep.subr.bf16.mxu0 %v743_v31  ;;  %1902 = vmatprep.subr.bf16.mxu1 %v759_v44  ;;  %4289 = vst [vmem:[#allocation72_spill] sm:$0xff] %v3175_v50  ;;  %v487_v38 = vshll.u32 %v3154_v0, 16  ;;  %v3182_v35 = vld [vmem:[%s2883_s26 + $0x1f0] sm:$0xff]  ;;  %v3185_v31 = vld [vmem:[%s2883_s26 + $0x1f8] sm:$0xff]  ;;  %v744_v61 = vpack.c.bf16 %v503_v52, %v502_v37  ;;  %v518_v43 = vshll.u32 %v3161_v30, 16 }
 0x12d   : > { %4290 = vst [vmem:[#allocation73_spill] sm:$0xff] %v3182_v35  ;;  %4291 = vst [vmem:[#allocation74_spill] sm:$0xff] %v3185_v31  ;;  %v519_v25 = vshll.u32 %v3164_v49, 16  ;;  %v3192_v44 = vld [vmem:[%s2883_s26 + $0x70] sm:$0xff]  ;;  %v3195_v24 = vld [vmem:[%s2883_s26 + $0x78] sm:$0xff] }
 0x12e   : > { %1881 = vmatpush3.bf16.msra.mxu0 %v735_v36  ;;  %v760_v36 = vpack.c.bf16 %v535_v63, %v534_v18  ;;  %4292 = vst [vmem:[#allocation75_spill] sm:$0xff] %v3192_v44  ;;  %4293 = vst [vmem:[#allocation76_spill] sm:$0xff] %v3195_v24  ;;  %v736_v0 = vpack.c.bf16 %v487_v38, %v486_v62  ;;  %v3201_v37 = vld [vmem:[%s2883_s26 + $0x170] sm:$0xff]  ;;  %v3204_v52 = vld [vmem:[%s2883_s26 + $0x178] sm:$0xff]  ;;  %v505_v38 = vshll.u32 %v3175_v50, 16  ;;  %v536_v62 = vshll.u32 %v3182_v35, 16 }
 0x12f   : > { %1903 = vmatpush3.bf16.msra.mxu1 %v751_v57  ;;  %v504_v57 = vshll.u32 %v3172_v58, 16  ;;  %4294 = vst [vmem:[#allocation77_spill] sm:$0xff] %v3201_v37  ;;  %4295 = vst [vmem:[#allocation78_spill] sm:$0xff] %v3204_v52  ;;  %1882 = vmatprep.subr.bf16.mxu0 %v744_v61  ;;  %v752_v18 = vpack.c.bf16 %v519_v25, %v518_v43  ;;  %v537_v63 = vshll.u32 %v3185_v31, 16  ;;  %v3212_v19 = vld [vmem:[%s2883_s26 + $0x280] sm:$0xff]  ;;  %v3215_v17 = vld [vmem:[%s2883_s26 + $0x288] sm:$0xff] }
 0x130   : > { %1904 = vmatprep.subr.bf16.mxu1 %v760_v36  ;;  %4296 = vst [vmem:[#allocation79_spill] sm:$0xff] %v3212_v19  ;;  %4297 = vst [vmem:[#allocation80_spill] sm:$0xff] %v3215_v17  ;;  %v3218_v58 = vld [vmem:[%s2883_s26 + $0x380] sm:$0xff]  ;;  %v488_v61 = vshll.u32 %v3192_v44, 16  ;;  %v489_v25 = vshll.u32 %v3195_v24, 16  ;;  %v3225_v31 = vld [vmem:[%s2883_s26 + $0x388] sm:$0xff] }
 0x131   : > { %4298 = vst [vmem:[#allocation81_spill] sm:$0xff] %v3218_v58  ;;  %4299 = vst [vmem:[#allocation82_spill] sm:$0xff] %v3225_v31  ;;  %v3228_v35 = vld [vmem:[%s2883_s26 + $0x200] sm:$0xff]  ;;  %v3231_v50 = vld [vmem:[%s2883_s26 + $0x208] sm:$0xff]  ;;  %v745_v49 = vpack.c.bf16 %v505_v38, %v504_v57  ;;  %v520_v30 = vshll.u32 %v3201_v37, 16  ;;  %v521_v23 = vshll.u32 %v3204_v52, 16 }
 0x132   : > { %1883 = vmatpush3.bf16.msra.mxu0 %v736_v0  ;;  %4300 = vst [vmem:[#allocation83_spill] sm:$0xff] %v3228_v35  ;;  %4301 = vst [vmem:[#allocation84_spill] sm:$0xff] %v3231_v50  ;;  %v761_v0 = vpack.c.bf16 %v537_v63, %v536_v62  ;;  %v3236_v22 = vld [vmem:[%s2883_s26 + $0x300] sm:$0xff]  ;;  %v3239_v43 = vld [vmem:[%s2883_s26 + $0x308] sm:$0xff]  ;;  %v737_v24 = vpack.c.bf16 %v489_v25, %v488_v61  ;;  %v4308_v63 = vmov 0  ;;  %v3266_v61 = vpack.c.bf16 %v3144_v51, %v3144_v51 }
 0x133   : > { %1905 = vmatpush3.bf16.msra.mxu1 %v752_v18  ;;  %4302 = vst [vmem:[#allocation85_spill] sm:$0xff] %v3236_v22  ;;  %4303 = vst [vmem:[#allocation86_spill] sm:$0xff] %v3239_v43  ;;  %v3242_v36 = vld [vmem:[%s2883_s26 + $0x290] sm:$0xff]  ;;  %v3249_v57 = vld [vmem:[%s2883_s26 + $0x298] sm:$0xff]  ;;  %1884 = vmatprep.subr.bf16.mxu0 %v745_v49  ;;  %v753_v62 = vpack.c.bf16 %v521_v23, %v520_v30  ;;  %v554_v25 = vshll.u32 %v3212_v19, 16  ;;  %v555_v5 = vshll.u32 %v3215_v17, 16 }
 0x134   : > { %4304 = vst [vmem:[#allocation87_spill] sm:$0xff] %v3242_v36  ;;  %4305 = vst [vmem:[#allocation88_spill] sm:$0xff] %v3249_v57  ;;  %v3252_v18 = vld [vmem:[%s2883_s26 + $0x390] sm:$0xff]  ;;  %v3255_v38 = vld [vmem:[%s2883_s26 + $0x398] sm:$0xff]  ;;  %1906 = vmatprep.subr.bf16.mxu1 %v761_v0  ;;  %v586_v23 = vshll.u32 %v3218_v58, 16  ;;  %v587_v16 = vshll.u32 %v3225_v31, 16 }
 0x135   : > { %4306 = vst [vmem:[#allocation89_spill] sm:$0xff] %v3252_v18  ;;  %4307 = vst [vmem:[#allocation90_spill] sm:$0xff] %v3255_v38  ;;  %v3272_v49 = vld [vmem:[%s2883_s26 + $0x210] sm:$0xff]  ;;  %v3275_v0 = vld [vmem:[%s2883_s26 + $0x218] sm:$0xff]  ;;  %v538_v44 = vshll.u32 %v3228_v35, 16  ;;  %v570_v17 = vshll.u32 %v3236_v22, 16  ;;  %v770_v6 = vpack.c.bf16 %v555_v5, %v554_v25 }
 0x136   : > { %vm3260_vm6 = vmand %vm1127_vm1, %vm1136_vm5  ;;  %4311 = vst [vmem:[#allocation92_spill] sm:$0xff] %v3272_v49  ;;  %1885 = vmatpush3.bf16.msra.mxu0 %v737_v24  ;;  %v3287_v51 = vld [vmem:[%s2883_s26 + $0x310] sm:$0xff]  ;;  %v3290_v30 = vld [vmem:[%s2883_s26 + $0x318] sm:$0xff]  ;;  %v4315_v24 = vmov 0  ;;  %v571_v52 = vshll.u32 %v3239_v43, 16  ;;  %v556_v31 = vshll.u32 %v3242_v36, 16  ;;  %v786_v5 = vpack.c.bf16 %v587_v16, %v586_v23 }
 0x137   : > { %v4309_v63 = vsel %vm3260_vm6, 4294967295, %v4308_v63  ;;  %4312 = vst [vmem:[#allocation93_spill] sm:$0xff] %v3275_v0  ;;  %vm1812_vm8 = vmpackc.low %vm3260_vm6, %vm3260_vm6  ;;  %1907 = vmatpush3.bf16.msra.mxu1 %v753_v62  ;;  %v539_v62 = vshll.u32 %v3231_v50, 16  ;;  %v3310_v58 = vld [vmem:[%s2883_s26 + $0x2a0] sm:$0xff]  ;;  %v3313_v19 = vld [vmem:[%s2883_s26 + $0x2a8] sm:$0xff]  ;;  %v557_v35 = vshll.u32 %v3249_v57, 16  ;;  %1914 = vmatprep.subr.bf16.mxu0 %v770_v6  ;;  %vm1131_vm1 = vcmp.ge.s32.totalorder %v2900_v8, %v2888_v4 }
 0x138   : > { %4310 = vst [vmem:[#allocation91_spill] sm:$0xff] %v4309_v63  ;;  %4313 = vst [vmem:[#allocation94_spill] sm:$0xff] %v3287_v51  ;;  %1814 = vmatprep.mubr.msk.bf16.mxu0 %vm1812_vm8, %v3266_v61  ;;  %v3322_v50 = vld [vmem:[%s2883_s26 + $0x3a0] sm:$0xff]  ;;  %v3325_v22 = vld [vmem:[%s2883_s26 + $0x3a8] sm:$0xff]  ;;  %v4322_v25 = vmov 0  ;;  %v588_v36 = vshll.u32 %v3252_v18, 16  ;;  %v778_v3 = vpack.c.bf16 %v571_v52, %v570_v17  ;;  %1936 = vmatprep.subr.bf16.mxu1 %v786_v5 }
 0x139   : > { %4314 = vst [vmem:[#allocation95_spill] sm:$0xff] %v3290_v30  ;;  %vm3301_vm11 = vmand %vm1129_vm2, %vm1138_vm7  ;;  %v762_v57 = vpack.c.bf16 %v539_v62, %v538_v44  ;;  %v589_v43 = vshll.u32 %v3255_v38, 16  ;;  %v3349_v37 = vld [vmem:[%s2883_s26 + $0x228] sm:$0xff]  ;;  %v771_v63 = vpack.c.bf16 %v557_v35, %v556_v31  ;;  %v540_v16 = vshll.u32 %v3272_v49, 16  ;;  %v3357_v23 = vld [vmem:[%s2883_s26 + $0x320] sm:$0xff] }
 0x13a   : > { %v4316_v24 = vsel %vm3301_vm11, 4294967295, %v4315_v24  ;;  %4318 = vst [vmem:[#allocation97_spill] sm:$0xff] %v3310_v58  ;;  %4319 = vst [vmem:[#allocation98_spill] sm:$0xff] %v3313_v19  ;;  %v541_v44 = vshll.u32 %v3275_v0, 16  ;;  %v3360_v62 = vld [vmem:[%s2883_s26 + $0x328] sm:$0xff]  ;;  %v4329_v17 = vmov 0  ;;  %vm1133_vm2 = vcmp.ge.s32.totalorder %v2903_v9, %v2888_v4 }
 0x13b   : > { %4317 = vst [vmem:[#allocation96_spill] sm:$0xff] %v4316_v24  ;;  %vm1818_vm12 = vmpackc.low %vm3301_vm11, %vm3301_vm11  ;;  %v3346_v24 = vld [vmem:[%s2883_s26 + $0x220] sm:$0xff]  ;;  %v787_v35 = vpack.c.bf16 %v589_v43, %v588_v36  ;;  %v572_v31 = vshll.u32 %v3287_v51, 16  ;;  %v573_v52 = vshll.u32 %v3290_v30, 16  ;;  %v558_v6 = vshll.u32 %v3310_v58, 16  ;;  %v3385_v0 = vld [vmem:[%s2883_s26 + $0x2b8] sm:$0xff] }
 0x13c   : > { %4320 = vst [vmem:[#allocation99_spill] sm:$0xff] %v3322_v50  ;;  %4321 = vst [vmem:[#allocation100_spill] sm:$0xff] %v3325_v22  ;;  %1820 = vmatprep.mubr.msk.bf16.mxu1 %vm1818_vm12, %v3266_v61  ;;  %v763_v7 = vpack.c.bf16 %v541_v44, %v540_v16  ;;  %v559_v43 = vshll.u32 %v3313_v19, 16  ;;  %v590_v36 = vshll.u32 %v3322_v50, 16  ;;  %v591_v5 = vshll.u32 %v3325_v22, 16  ;;  %v3394_v58 = vld [vmem:[%s2883_s26 + $0x3b0] sm:$0xff] }
 0x13d   : > { %vm3339_vm13 = vmand %vm1126_vm3, %vm1135_vm9  ;;  %4325 = vst [vmem:[#allocation102_spill] sm:$0xff] %v3346_v24  ;;  %v3397_v30 = vld [vmem:[%s2883_s26 + $0x3b8] sm:$0xff]  ;;  %v542_v16 = vshll.u32 %v3346_v24, 16  ;;  %v543_v44 = vshll.u32 %v3349_v37, 16  ;;  %v574_v22 = vshll.u32 %v3357_v23, 16  ;;  %v3409_v50 = vld [vmem:[%s2883_s26 + $0x230] sm:$0xff]  ;;  %vm1130_vm3 = vcmp.ge.s32.totalorder %v2918_v14, %v2888_v4 }
 0x13e   : > { %v4323_v25 = vsel %vm3339_vm13, 4294967295, %v4322_v25  ;;  %4326 = vst [vmem:[#allocation103_spill] sm:$0xff] %v3349_v37  ;;  %vm1815_vm14 = vmpackc.low %vm3339_vm13, %vm3339_vm13  ;;  %v3412_v19 = vld [vmem:[%s2883_s26 + $0x238] sm:$0xff]  ;;  %v3415_v51 = vld [vmem:[%s2883_s26 + $0x330] sm:$0xff]  ;;  %v788_v49 = vpack.c.bf16 %v591_v5, %v590_v36  ;;  %v561_v24 = vshll.u32 %v3385_v0, 16  ;;  %v592_v38 = vshll.u32 %v3394_v58, 16 }
 0x13f   : > { %4324 = vst [vmem:[#allocation101_spill] sm:$0xff] %v4323_v25  ;;  %4327 = vst [vmem:[#allocation104_spill] sm:$0xff] %v3357_v23  ;;  %1817 = vmatmul.mubr.msk.bf16.vlgmr.msra.gmra.mrb[0].mxu0 %vm1815_vm14, %v3266_v61  ;;  %v3382_v25 = vld [vmem:[%s2883_s26 + $0x2b0] sm:$0xff]  ;;  %v3423_v23 = vld [vmem:[%s2883_s26 + $0x2c0] sm:$0xff]  ;;  %v764_v37 = vpack.c.bf16 %v543_v44, %v542_v16  ;;  %v576_v16 = vshll.u32 %v3415_v51, 16  ;;  %vm1142_vm7 = vcmp.lt.s32.totalorder %v2903_v9, %v2915_v13  ;;  %v813_v9 = vand.u32 4294901760, %v2953_v34 }
 0x140   : > { %4328 = vst [vmem:[#allocation105_spill] sm:$0xff] %v3360_v62  ;;  %vm3374_vm15 = vmand %vm1128_vm4, %vm1137_vm10  ;;  %1915 = vmatpush3.bf16.msra.mxu0 %v762_v57  ;;  %v779_v57 = vpack.c.bf16 %v573_v52, %v572_v31  ;;  %v560_v31 = vshll.u32 %v3382_v25, 16  ;;  %v3420_v52 = vld [vmem:[%s2883_s26 + $0x338] sm:$0xff]  ;;  %v3435_v36 = vld [vmem:[%s2883_s26 + $0x3c8] sm:$0xff]  ;;  %vm1140_vm4 = vcmp.lt.s32.totalorder %v2900_v8, %v2915_v13  ;;  %vm1139_vm9 = vcmp.lt.s32.totalorder %v2918_v14, %v2915_v13 }
 0x141   : > { %v4330_v17 = vsel %vm3374_vm15, 4294967295, %v4329_v17  ;;  %4332 = vst [vmem:[#allocation107_spill] sm:$0xff] %v3382_v25  ;;  %4333 = vst [vmem:[#allocation108_spill] sm:$0xff] %v3385_v0  ;;  %1916 = vmatprep.subr.bf16.mxu0 %v771_v63  ;;  %v575_v63 = vshll.u32 %v3360_v62, 16  ;;  %v544_v25 = vshll.u32 %v3409_v50, 16  ;;  %v3441_v44 = vld [vmem:[%s2883_s26 + $0x240] sm:$0xff]  ;;  %vm1132_vm10 = vcmp.ge.s32.totalorder %v2921_v15, %v2888_v4 }
 0x142   : > { %4331 = vst [vmem:[#allocation106_spill] sm:$0xff] %v4330_v17  ;;  %vm4211_vm0 = vmpackc.low %vm3374_vm15, %vm3374_vm15  ;;  %v772_v17 = vpack.c.bf16 %v559_v43, %v558_v6  ;;  %v3429_v6 = vld [vmem:[%s2883_s26 + $0x2c8] sm:$0xff]  ;;  %v3432_v43 = vld [vmem:[%s2883_s26 + $0x3c0] sm:$0xff]  ;;  %v773_v0 = vpack.c.bf16 %v561_v24, %v560_v31  ;;  %v595_v24 = vshll.u32 %v3435_v36, 16  ;;  %v4366_v8 = vand.u32 4294901760, %v2906_v10 }
 0x143   : > { %4334 = vst [vmem:[#allocation109_spill] sm:$0xff] %v3394_v58  ;;  %4335 = vst [vmem:[#allocation110_spill] sm:$0xff] %v3397_v30  ;;  %1823 = vmatmul.mubr.msk.bf16.vlgmr.msra.gmra.mrb[0].mxu1 %vm4211_vm0, %v3266_v61  ;;  %v780_v5 = vpack.c.bf16 %v575_v63, %v574_v22  ;;  %v3447_v58 = vld [vmem:[%s2883_s26 + $0x340] sm:$0xff]  ;;  %v577_v22 = vshll.u32 %v3420_v52, 16  ;;  %v3452_v63 = vld [vmem:[%s2883_s26 + $0x348] sm:$0xff]  ;;  %v594_v18 = vshll.u32 %v3432_v43, 16 }
 0x144   : > { %4336 = vst [vmem:[#allocation111_spill] sm:$0xff] %v3409_v50  ;;  %4337 = vst [vmem:[#allocation112_spill] sm:$0xff] %v3412_v19  ;;  %1937 = vmatpush3.bf16.msra.mxu1 %v778_v3  ;;  %v593_v3 = vshll.u32 %v3397_v30, 16  ;;  %1917 = vmatpush3.bf16.msra.mxu0 %v763_v7  ;;  %v3444_v30 = vld [vmem:[%s2883_s26 + $0x248] sm:$0xff]  ;;  %v562_v7 = vshll.u32 %v3423_v23, 16  ;;  %v563_v50 = vshll.u32 %v3429_v6, 16 }
 0x145   : > { %4338 = vst [vmem:[#allocation113_spill] sm:$0xff] %v3415_v51  ;;  %4339 = vst [vmem:[#allocation114_spill] sm:$0xff] %v3420_v52  ;;  %1938 = vmatprep.subr.bf16.mxu1 %v787_v35  ;;  %v545_v35 = vshll.u32 %v3412_v19, 16  ;;  %1918 = vmatprep.subr.bf16.mxu0 %v772_v17  ;;  %v3455_v51 = vld [vmem:[%s2883_s26 + $0x2d0] sm:$0xff]  ;;  %v3467_v31 = vld [vmem:[%s2883_s26 + $0x3d8] sm:$0xff] }
 0x146   : > { %4340 = vst [vmem:[#allocation115_spill] sm:$0xff] %v3423_v23  ;;  %4341 = vst [vmem:[#allocation116_spill] sm:$0xff] %v3429_v6  ;;  %v789_v62 = vpack.c.bf16 %v593_v3, %v592_v38  ;;  %v3461_v38 = vld [vmem:[%s2883_s26 + $0x2d8] sm:$0xff]  ;;  %v3464_v17 = vld [vmem:[%s2883_s26 + $0x3d0] sm:$0xff]  ;;  %v781_v3 = vpack.c.bf16 %v577_v22, %v576_v16  ;;  %v546_v23 = vshll.u32 %v3441_v44, 16  ;;  %v790_v16 = vpack.c.bf16 %v595_v24, %v594_v18 }
 0x147   : > { %4342 = vst [vmem:[#allocation117_spill] sm:$0xff] %v3432_v43  ;;  %4343 = vst [vmem:[#allocation118_spill] sm:$0xff] %v3435_v36  ;;  %v765_v19 = vpack.c.bf16 %v545_v35, %v544_v25  ;;  %v547_v25 = vshll.u32 %v3444_v30, 16  ;;  %v3473_v35 = vld [vmem:[%s2883_s26 + $0x250] sm:$0xff]  ;;  %v3476_v36 = vld [vmem:[%s2883_s26 + $0x258] sm:$0xff]  ;;  %v579_v22 = vshll.u32 %v3452_v63, 16 }
 0x148   : > { %4344 = vst [vmem:[#allocation119_spill] sm:$0xff] %v3441_v44  ;;  %4345 = vst [vmem:[#allocation120_spill] sm:$0xff] %v3444_v30  ;;  %1939 = vmatpush3.bf16.msra.mxu1 %v779_v57  ;;  %v578_v57 = vshll.u32 %v3447_v58, 16  ;;  %v3479_v43 = vld [vmem:[%s2883_s26 + $0x350] sm:$0xff]  ;;  %1919 = vmatpush3.bf16.msra.mxu0 %v764_v37  ;;  %v564_v30 = vshll.u32 %v3455_v51, 16  ;;  %v3489_v44 = vld [vmem:[%s2883_s26 + $0x2e0] sm:$0xff] }
 0x149   : > { %4346 = vst [vmem:[#allocation121_spill] sm:$0xff] %v3447_v58  ;;  %4347 = vst [vmem:[#allocation122_spill] sm:$0xff] %v3452_v63  ;;  %1940 = vmatprep.subr.bf16.mxu1 %v788_v49  ;;  %v774_v49 = vpack.c.bf16 %v563_v50, %v562_v7  ;;  %v3486_v58 = vld [vmem:[%s2883_s26 + $0x358] sm:$0xff]  ;;  %1920 = vmatprep.subr.bf16.mxu0 %v773_v0  ;;  %v766_v6 = vpack.c.bf16 %v547_v25, %v546_v23  ;;  %v565_v52 = vshll.u32 %v3461_v38, 16  ;;  %v3495_v37 = vld [vmem:[%s2883_s26 + $0x2e8] sm:$0xff] }
 0x14a   : > { %4348 = vst [vmem:[#allocation123_spill] sm:$0xff] %v3455_v51  ;;  %4349 = vst [vmem:[#allocation124_spill] sm:$0xff] %v3461_v38  ;;  %v596_v56 = vshll.u32 %v3464_v17, 16  ;;  %v597_v50 = vshll.u32 %v3467_v31, 16  ;;  %v3498_v18 = vld [vmem:[%s2883_s26 + $0x3e0] sm:$0xff]  ;;  %v3501_v7 = vld [vmem:[%s2883_s26 + $0x3e8] sm:$0xff]  ;;  %v782_v0 = vpack.c.bf16 %v579_v22, %v578_v57 }
 0x14b   : > { %4350 = vst [vmem:[#allocation125_spill] sm:$0xff] %v3464_v17  ;;  %4351 = vst [vmem:[#allocation126_spill] sm:$0xff] %v3467_v31  ;;  %v548_v23 = vshll.u32 %v3473_v35, 16  ;;  %v549_v24 = vshll.u32 %v3476_v36, 16  ;;  %v580_v25 = vshll.u32 %v3479_v43, 16  ;;  %v3509_v31 = vld [vmem:[%s2883_s26 + $0x260] sm:$0xff]  ;;  %v775_v51 = vpack.c.bf16 %v565_v52, %v564_v30 }
 0x14c   : > { %4352 = vst [vmem:[#allocation127_spill] sm:$0xff] %v3473_v35  ;;  %4353 = vst [vmem:[#allocation128_spill] sm:$0xff] %v3476_v36  ;;  %1941 = vmatpush3.bf16.msra.mxu1 %v780_v5  ;;  %v3512_v17 = vld [vmem:[%s2883_s26 + $0x268] sm:$0xff]  ;;  %v3515_v38 = vld [vmem:[%s2883_s26 + $0x360] sm:$0xff]  ;;  %v791_v63 = vpack.c.bf16 %v597_v50, %v596_v56  ;;  %v581_v5 = vshll.u32 %v3486_v58, 16  ;;  %v566_v57 = vshll.u32 %v3489_v44, 16  ;;  %1921 = vmatpush3.bf16.msra.mxu0 %v765_v19 }
 0x14d   : > { %4354 = vst [vmem:[#allocation129_spill] sm:$0xff] %v3479_v43  ;;  %4355 = vst [vmem:[#allocation130_spill] sm:$0xff] %v3486_v58  ;;  %1942 = vmatprep.subr.bf16.mxu1 %v789_v62  ;;  %v3520_v22 = vld [vmem:[%s2883_s26 + $0x368] sm:$0xff]  ;;  %v3523_v43 = vld [vmem:[%s2883_s26 + $0x2f0] sm:$0xff]  ;;  %v767_v36 = vpack.c.bf16 %v549_v24, %v548_v23  ;;  %v567_v35 = vshll.u32 %v3495_v37, 16  ;;  %v598_v55 = vshll.u32 %v3498_v18, 16  ;;  %1922 = vmatprep.subr.bf16.mxu0 %v774_v49 }
 0x14e   : > { %4356 = vst [vmem:[#allocation131_spill] sm:$0xff] %v3489_v44  ;;  %4357 = vst [vmem:[#allocation132_spill] sm:$0xff] %v3495_v37  ;;  %v599_v30 = vshll.u32 %v3501_v7, 16  ;;  %v3529_v56 = vld [vmem:[%s2883_s26 + $0x2f8] sm:$0xff]  ;;  %v3532_v62 = vld [vmem:[%s2883_s26 + $0x3f0] sm:$0xff]  ;;  %v783_v50 = vpack.c.bf16 %v581_v5, %v580_v25  ;;  %v550_v44 = vshll.u32 %v3509_v31, 16 }
 0x14f   : > { %4358 = vst [vmem:[#allocation133_spill] sm:$0xff] %v3498_v18  ;;  %4359 = vst [vmem:[#allocation134_spill] sm:$0xff] %v3501_v7  ;;  %v3535_v52 = vld [vmem:[%s2883_s26 + $0x3f8] sm:$0xff]  ;;  %v551_v19 = vshll.u32 %v3512_v17, 16  ;;  %v582_v23 = vshll.u32 %v3515_v38, 16  ;;  %v3541_v24 = vld [vmem:[%s2883_s26 + $0x270] sm:$0xff]  ;;  %v776_v37 = vpack.c.bf16 %v567_v35, %v566_v57 }
 0x150   : > { %4360 = vst [vmem:[#allocation135_spill] sm:$0xff] %v3509_v31  ;;  %4361 = vst [vmem:[#allocation136_spill] sm:$0xff] %v3512_v17  ;;  %v3544_v18 = vld [vmem:[%s2883_s26 + $0x278] sm:$0xff]  ;;  %v3547_v7 = vld [vmem:[%s2883_s26 + $0x370] sm:$0xff]  ;;  %1943 = vmatpush3.bf16.msra.mxu1 %v781_v3  ;;  %v792_v58 = vpack.c.bf16 %v599_v30, %v598_v55  ;;  %v583_v45 = vshll.u32 %v3520_v22, 16  ;;  %v568_v49 = vshll.u32 %v3523_v43, 16  ;;  %1923 = vmatpush3.bf16.msra.mxu0 %v766_v6 }
 0x151   : > { %4362 = vst [vmem:[#allocation137_spill] sm:$0xff] %v3515_v38  ;;  %4363 = vst [vmem:[#allocation138_spill] sm:$0xff] %v3523_v43  ;;  %v3552_v25 = vld [vmem:[%s2883_s26 + $0x378] sm:$0xff]  ;;  %1944 = vmatprep.subr.bf16.mxu1 %v790_v16  ;;  %v768_v5 = vpack.c.bf16 %v551_v19, %v550_v44  ;;  %v569_v38 = vshll.u32 %v3529_v56, 16  ;;  %v600_v17 = vshll.u32 %v3532_v62, 16  ;;  %v601_v31 = vshll.u32 %v3535_v52, 16  ;;  %1924 = vmatprep.subr.bf16.mxu0 %v775_v51 }
 0x152   : > { %v784_v3 = vpack.c.bf16 %v583_v45, %v582_v23  ;;  %v552_v55 = vshll.u32 %v3541_v24, 16  ;;  %v553_v35 = vshll.u32 %v3544_v18, 16  ;;  %v584_v57 = vshll.u32 %v3547_v7, 16  ;;  %vm3568_vm5 = vmand %vm1131_vm1, %vm1140_vm4  ;;  %v1528_v10 = vld [vmem:[#allocation12 + $0x98] sm:$0xff] (!%p1860_p13) }
 0x153   : > { %v777_v30 = vpack.c.bf16 %v569_v38, %v568_v49  ;;  %v793_v43 = vpack.c.bf16 %v601_v31, %v600_v17  ;;  %v585_v16 = vshll.u32 %v3552_v25, 16  ;;  %vm1824_vm0 = vmpackc.low %vm3568_vm5, %vm3568_vm5  ;;  %vm1141_vm1 = vcmp.lt.s32.totalorder %v2921_v15, %v2915_v13  ;;  %v4411_v13 = vld [vmem:[#allocation54_spill] sm:$0xff]  ;;  %v4413_v15 = vld [vmem:[#allocation55_spill] sm:$0xff] }
 0x154   : > { %1945 = vmatpush3.bf16.msra.mxu1 %v782_v0  ;;  %v769_v44 = vpack.c.bf16 %v553_v35, %v552_v55  ;;  %v4367_v6 = vand.u32 4294901760, %v2909_v11  ;;  %v4368_v17 = vand.u32 4294901760, %v2912_v12  ;;  %v4369_v31 = vand.u32 4294901760, %v2928_v20  ;;  %1925 = vmatpush3.bf16.msra.mxu0 %v767_v36  ;;  %vm3602_vm4 = vmand %vm1133_vm2, %vm1142_vm7 }
 0x155   : > { %1946 = vmatprep.subr.bf16.mxu1 %v791_v63  ;;  %v785_v51 = vpack.c.bf16 %v585_v16, %v584_v57  ;;  %1826 = vmatprep.mubr.msk.bf16.mxu0 %vm1824_vm0, %v3266_v61  ;;  %v4372_v11 = vand.u32 4294901760, %v2931_v21  ;;  %v4373_v12 = vand.u32 4294901760, %v2938_v26  ;;  %v4374_v36 = vand.u32 4294901760, %v2941_v27  ;;  %vm1830_vm2 = vmpackc.low %vm3602_vm4, %vm3602_vm4 }
 0x156   : > { %v1058_v38 = vpack.c.bf16 %v4367_v6, %v4366_v8  ;;  %v3591_v0 = vpack.c.bf16 %v4369_v31, %v4368_v17  ;;  %v4375_v63 = vand.u32 4294901760, %v2947_v32  ;;  %v812_v23 = vand.u32 4294901760, %v2950_v33  ;;  %1926 = vmatprep.subr.bf16.mxu0 %v776_v37  ;;  %1832 = vmatprep.mubr.msk.bf16.mxu1 %vm1830_vm2, %v3266_v61  ;;  %vm3672_vm7 = vmand %vm1130_vm3, %vm1139_vm9  ;;  %v4392_v17 = vld [vmem:[#allocation44_spill] sm:$0xff] }
 0x157   : > { %v3610_v20 = vpack.c.bf16 %v4373_v12, %v4372_v11  ;;  %v844_v21 = vand.u32 4294901760, %v2959_v39  ;;  %v845_v26 = vand.u32 4294901760, %v2962_v40  ;;  %v4376_v49 = vand.u32 4294901760, %v2965_v41  ;;  %vm3702_vm3 = vmand %vm1132_vm10, %vm1141_vm1 }
 0x158   : > { %v3616_v19 = vpack.c.bf16 %v4375_v63, %v4374_v36  ;;  %v4377_v27 = vand.u32 4294901760, %v2971_v46  ;;  %v4378_v55 = vand.u32 4294901760, %v2974_v47  ;;  %v4379_v33 = vand.u32 4294901760, %v2977_v48  ;;  %1947 = vmatpush3.bf16.msra.mxu1 %v783_v50  ;;  %1927 = vmatpush3.bf16.msra.mxu0 %v768_v5  ;;  %v4396_v36 = vld [vmem:[#allocation46_spill] sm:$0xff]  ;;  %vm1827_vm9 = vmpackc.low %vm3672_vm7, %vm3672_vm7 }
 0x159   : > { %v1059_v39 = vpack.c.bf16 %v813_v9, %v812_v23  ;;  %v814_v40 = vand.u32 4294901760, %v2983_v53  ;;  %v815_v41 = vand.u32 4294901760, %v2986_v54  ;;  %v846_v46 = vand.u32 4294901760, %v2993_v59  ;;  %1948 = vmatprep.subr.bf16.mxu1 %v792_v58  ;;  %v4384_v58 = vld [vmem:[#allocation40_spill] sm:$0xff]  ;;  %1928 = vmatprep.subr.bf16.mxu0 %v777_v30  ;;  %v4394_v30 = vld [vmem:[#allocation45_spill] sm:$0xff]  ;;  %v4398_v9 = vld [vmem:[#allocation47_spill] sm:$0xff] }
 0x15a   : > { %v3629_v32 = vpack.c.bf16 %v4377_v27, %v4376_v49  ;;  %v3635_v34 = vpack.c.bf16 %v4379_v33, %v4378_v55  ;;  %v3646_v47 = vpack.c.bf16 %v845_v26, %v844_v21  ;;  %v847_v48 = vand.u32 4294901760, %v2996_v60  ;;  %v4385_v60 = vld [vmem:[#allocation41_spill] sm:$0xff]  ;;  %v4399_v26 = vld [vmem:[#allocation48_spill] sm:$0xff]  ;;  %vm1833_vm10 = vmpackc.low %vm3702_vm3, %vm3702_vm3 }
 0x15b   : > { %v4380_v37 = vand.u32 4294901760, %v3001_v1  ;;  %v4381_v50 = vand.u32 4294901760, %v3004_v2  ;;  %v4382_v57 = vand.u32 4294901760, %v3010_v28  ;;  %v4383_v16 = vand.u32 4294901760, %v3013_v29  ;;  %v4389_v28 = vld [vmem:[#allocation42_spill] sm:$0xff]  ;;  %v4400_v27 = vld [vmem:[#allocation49_spill] sm:$0xff]  ;;  %vm4512_vm6 = vmpackc.low %vm3374_vm15, %vm3374_vm15 }
 0x15c   : > { %v3661_v54 = vpack.c.bf16 %v815_v41, %v814_v40  ;;  %v816_v59 = vand.u32 4294901760, %v3019_v42  ;;  %v817_v8 = vand.u32 4294901760, %v4384_v58  ;;  %v848_v6 = vand.u32 4294901760, %v4385_v60  ;;  %v4390_v42 = vld [vmem:[#allocation43_spill] sm:$0xff]  ;;  %1949 = vmatpush3.bf16.msra.mxu1 %v784_v3  ;;  %v4404_v40 = vld [vmem:[#allocation50_spill] sm:$0xff]  ;;  %1929 = vmatpush3.bf16.msra.mxu0 %v769_v44  ;;  %v4414_v60 = vld [vmem:[#allocation56_spill] sm:$0xff] }
 0x15d   : > { %v3653_v35 = vpack.c.bf16 %v4381_v50, %v4380_v37  ;;  %v3659_v53 = vpack.c.bf16 %v4383_v16, %v4382_v57  ;;  %v4386_v1 = vmov 0  ;;  %v3676_v2 = vpack.c.bf16 %v847_v48, %v846_v46  ;;  %1950 = vmatprep.subr.bf16.mxu1 %v793_v43  ;;  %v4405_v46 = vld [vmem:[#allocation51_spill] sm:$0xff]  ;;  %v4407_v37 = vld [vmem:[#allocation52_spill] sm:$0xff]  ;;  %v4409_v43 = vld [vmem:[#allocation53_spill] sm:$0xff]  ;;  %1958 = vmatprep.subr.bf16.mxu0 %v1058_v38 }
 0x15e   : > { %v4387_v1 = vsel %vm3672_vm7, 4294967295, %v4386_v1  ;;  %v849_v29 = vand.u32 4294901760, %v4389_v28  ;;  %v4391_v5 = vand.u32 4294901760, %v4390_v42  ;;  %v4393_v31 = vand.u32 4294901760, %v4392_v17  ;;  %v4415_v28 = vld [vmem:[#allocation57_spill] sm:$0xff]  ;;  %v4419_v44 = vld [vmem:[#allocation60_spill] sm:$0xff] }
 0x15f   : > { %4388 = vst [vmem:[#allocation40_spill] sm:$0xff] %v4387_v1  ;;  %v4395_v12 = vand.u32 4294901760, %v4394_v30  ;;  %v4397_v63 = vand.u32 4294901760, %v4396_v36  ;;  %v3691_v14 = vpack.c.bf16 %v817_v8, %v816_v59  ;;  %v818_v21 = vand.u32 4294901760, %v4398_v9  ;;  %1829 = vmatmul.mubr.msk.bf16.vlgmr.msra.gmra.mrb[4].mxu0 %vm1827_vm9, %v3266_v61 }
 0x160   : > { %v3683_v11 = vpack.c.bf16 %v4393_v31, %v4391_v5  ;;  %v819_v49 = vand.u32 4294901760, %v4399_v26  ;;  %v850_v55 = vand.u32 4294901760, %v4400_v27  ;;  %v4401_v33 = vmov 0  ;;  %v4416_v5 = vld [vmem:[#allocation58_spill] sm:$0xff]  ;;  %v4417_v31 = vld [vmem:[#allocation59_spill] sm:$0xff]  ;;  %1951 = vmatpush3.bf16.msra.mxu1 %v785_v51  ;;  %1959 = vmatpush3.bf16.msra.mxu0 %v3610_v20 }
 0x161   : > { %v3689_v23 = vpack.c.bf16 %v4397_v63, %v4395_v12  ;;  %v4402_v33 = vsel %vm3702_vm3, 4294967295, %v4401_v33  ;;  %v3706_v3 = vpack.c.bf16 %v849_v29, %v848_v6  ;;  %v851_v41 = vand.u32 4294901760, %v4404_v40  ;;  %v4421_v63 = vld [vmem:[#allocation61_spill] sm:$0xff]  ;;  %v4425_v27 = vld [vmem:[#allocation63_spill] sm:$0xff]  ;;  %v4426_v40 = vld [vmem:[#allocation64_spill] sm:$0xff]  ;;  %1980 = vmatprep.subr.bf16.mxu1 %v3591_v0  ;;  %1838 = vmatprep.mubr.msk.bf16.mxu0 %vm1812_vm8, %v3266_v61 }
 0x162   : > { %4403 = vst [vmem:[#allocation41_spill] sm:$0xff] %v4402_v33  ;;  %v4406_v48 = vand.u32 4294901760, %v4405_v46  ;;  %v4408_v50 = vand.u32 4294901760, %v4407_v37  ;;  %v4410_v16 = vand.u32 4294901760, %v4409_v43  ;;  %v4412_v59 = vand.u32 4294901760, %v4411_v13  ;;  %v4427_v46 = vld [vmem:[#allocation65_spill] sm:$0xff]  ;;  %1960 = vmatprep.subr.bf16.mxu0 %v1059_v39 }
 0x163   : > { %v3724_v4 = vpack.c.bf16 %v819_v49, %v818_v21  ;;  %v820_v8 = vand.u32 4294901760, %v4413_v15  ;;  %v821_v6 = vand.u32 4294901760, %v4414_v60  ;;  %v852_v29 = vand.u32 4294901760, %v4415_v28  ;;  %v4423_v21 = vld [vmem:[#allocation62_spill] sm:$0xff]  ;;  %v4429_v43 = vld [vmem:[#allocation67_spill] sm:$0xff]  ;;  %v4431_v13 = vld [vmem:[#allocation68_spill] sm:$0xff]  ;;  %1835 = vmatmul.mubr.msk.bf16.vlgmr.msra.gmra.mrb[4].mxu1 %vm1833_vm10, %v3266_v61 }
 0x164   : > { %v3713_v57 = vpack.c.bf16 %v4408_v50, %v4406_v48  ;;  %v3719_v58 = vpack.c.bf16 %v4412_v59, %v4410_v16  ;;  %v3729_v42 = vpack.c.bf16 %v851_v41, %v850_v55  ;;  %v853_v17 = vand.u32 4294901760, %v4416_v5  ;;  %v4428_v37 = vld [vmem:[#allocation66_spill] sm:$0xff]  ;;  %v4437_v0 = vld [vmem:[#allocation71_spill] sm:$0xff]  ;;  %1981 = vmatpush3.bf16.msra.mxu1 %v3616_v19  ;;  %1844 = vmatprep.mubr.msk.bf16.mxu1 %vm1818_vm12, %v3266_v61  ;;  %v4502_v33 = vld [vmem:[#allocation133_spill] sm:$0xff] }
 0x165   : > { %v4418_v30 = vand.u32 4294901760, %v4417_v31  ;;  %v4420_v12 = vand.u32 4294901760, %v4419_v44  ;;  %v4422_v9 = vand.u32 4294901760, %v4421_v63  ;;  %v4424_v26 = vand.u32 4294901760, %v4423_v21  ;;  %v4439_v44 = vld [vmem:[#allocation73_spill] sm:$0xff]  ;;  %1982 = vmatprep.subr.bf16.mxu1 %v3646_v47  ;;  %v4454_v19 = vld [vmem:[#allocation83_spill] sm:$0xff]  ;;  %1961 = vmatpush3.bf16.msra.mxu0 %v3629_v32 }
 0x166   : > { %v3747_v38 = vpack.c.bf16 %v821_v6, %v820_v8  ;;  %v822_v55 = vand.u32 4294901760, %v4425_v27  ;;  %v823_v41 = vand.u32 4294901760, %v4426_v40  ;;  %v854_v48 = vand.u32 4294901760, %v4427_v46  ;;  %v4433_v8 = vld [vmem:[#allocation69_spill] sm:$0xff]  ;;  %v4435_v6 = vld [vmem:[#allocation70_spill] sm:$0xff]  ;;  %1962 = vmatprep.subr.bf16.mxu0 %v3661_v54  ;;  %v4488_v63 = vld [vmem:[#allocation120_spill] sm:$0xff] }
 0x167   : > { %v3736_v36 = vpack.c.bf16 %v4420_v12, %v4418_v30  ;;  %v3742_v49 = vpack.c.bf16 %v4424_v26, %v4422_v9  ;;  %v3759_v51 = vpack.c.bf16 %v853_v17, %v852_v29  ;;  %v855_v50 = vand.u32 4294901760, %v4428_v37  ;;  %v4438_v17 = vld [vmem:[#allocation72_spill] sm:$0xff]  ;;  %v4441_v9 = vld [vmem:[#allocation74_spill] sm:$0xff]  ;;  %v4442_v26 = vld [vmem:[#allocation75_spill] sm:$0xff] }
 0x168   : > { %v4430_v16 = vand.u32 4294901760, %v4429_v43  ;;  %v4432_v59 = vand.u32 4294901760, %v4431_v13  ;;  %v4434_v60 = vand.u32 4294901760, %v4433_v8  ;;  %v4436_v28 = vand.u32 4294901760, %v4435_v6  ;;  %v4446_v46 = vld [vmem:[#allocation77_spill] sm:$0xff]  ;;  %v4448_v43 = vld [vmem:[#allocation78_spill] sm:$0xff]  ;;  %1983 = vmatpush3.bf16.msra.mxu1 %v3635_v34 }
 0x169   : > { %v3775_v31 = vpack.c.bf16 %v823_v41, %v822_v55  ;;  %v824_v29 = vand.u32 4294901760, %v4437_v0  ;;  %v825_v30 = vand.u32 4294901760, %v4438_v17  ;;  %v856_v12 = vand.u32 4294901760, %v4439_v44  ;;  %v4444_v55 = vld [vmem:[#allocation76_spill] sm:$0xff]  ;;  %v4452_v8 = vld [vmem:[#allocation81_spill] sm:$0xff]  ;;  %v4462_v39 = vld [vmem:[#allocation90_spill] sm:$0xff]  ;;  %1984 = vmatprep.subr.bf16.mxu1 %v3676_v2  ;;  %1963 = vmatpush3.bf16.msra.mxu0 %v3653_v35 }
 0x16a   : > { %v3766_v15 = vpack.c.bf16 %v4432_v59, %v4430_v16  ;;  %v3772_v5 = vpack.c.bf16 %v4436_v28, %v4434_v60  ;;  %v3792_v20 = vpack.c.bf16 %v855_v50, %v854_v48  ;;  %v857_v21 = vand.u32 4294901760, %v4441_v9  ;;  %v4451_v48 = vld [vmem:[#allocation79_spill] sm:$0xff]  ;;  %v4453_v28 = vld [vmem:[#allocation82_spill] sm:$0xff]  ;;  %v4455_v17 = vld [vmem:[#allocation84_spill] sm:$0xff]  ;;  %1964 = vmatprep.subr.bf16.mxu0 %v3691_v14 }
 0x16b   : > { %v4443_v27 = vand.u32 4294901760, %v4442_v26  ;;  %v4445_v40 = vand.u32 4294901760, %v4444_v55  ;;  %v4447_v37 = vand.u32 4294901760, %v4446_v46  ;;  %v4449_v16 = vand.u32 4294901760, %v4448_v43  ;;  %v4456_v44 = vld [vmem:[#allocation80_spill] sm:$0xff]  ;;  %v4457_v9 = vld [vmem:[#allocation85_spill] sm:$0xff] }
 0x16c   : > { %v3808_v59 = vpack.c.bf16 %v825_v30, %v824_v29  ;;  %v906_v60 = vand.u32 4294901760, %v4452_v8  ;;  %v3819_v6 = vpack.c.bf16 %v857_v21, %v856_v12  ;;  %v907_v0 = vand.u32 4294901760, %v4453_v28  ;;  %v4460_v21 = vld [vmem:[#allocation88_spill] sm:$0xff]  ;;  %v4461_v43 = vld [vmem:[#allocation89_spill] sm:$0xff]  ;;  %1985 = vmatpush3.bf16.msra.mxu1 %v3659_v53 }
 0x16d   : > { %v3799_v41 = vpack.c.bf16 %v4445_v40, %v4443_v27  ;;  %v3805_v13 = vpack.c.bf16 %v4449_v16, %v4447_v37  ;;  %v858_v29 = vand.u32 4294901760, %v4454_v19  ;;  %v859_v30 = vand.u32 4294901760, %v4455_v17  ;;  %v4458_v27 = vld [vmem:[#allocation86_spill] sm:$0xff]  ;;  %v4459_v40 = vld [vmem:[#allocation87_spill] sm:$0xff]  ;;  %v4463_v28 = vld [vmem:[#allocation92_spill] sm:$0xff]  ;;  %1986 = vmatprep.subr.bf16.mxu1 %v3706_v3  ;;  %1965 = vmatpush3.bf16.msra.mxu0 %v3683_v11 }
 0x16e   : > { %v890_v26 = vand.u32 4294901760, %v4457_v9  ;;  %v891_v55 = vand.u32 4294901760, %v4458_v27  ;;  %v876_v46 = vand.u32 4294901760, %v4459_v40  ;;  %v3830_v47 = vpack.c.bf16 %v907_v0, %v906_v60  ;;  %v4464_v17 = vld [vmem:[#allocation93_spill] sm:$0xff]  ;;  %v4465_v60 = vld [vmem:[#allocation94_spill] sm:$0xff]  ;;  %1966 = vmatprep.subr.bf16.mxu0 %v3724_v4  ;;  %v4497_v50 = vld [vmem:[#allocation128_spill] sm:$0xff] }
 0x16f   : > { %v3832_v12 = vpack.c.bf16 %v859_v30, %v858_v29  ;;  %v877_v37 = vand.u32 4294901760, %v4460_v21  ;;  %v908_v16 = vand.u32 4294901760, %v4461_v43  ;;  %v909_v8 = vand.u32 4294901760, %v4462_v39  ;;  %v4466_v29 = vld [vmem:[#allocation95_spill] sm:$0xff]  ;;  %v4467_v27 = vld [vmem:[#allocation97_spill] sm:$0xff] }
 0x170   : > { %v3837_v32 = vpack.c.bf16 %v891_v55, %v890_v26  ;;  %v860_v19 = vand.u32 4294901760, %v4463_v28  ;;  %v861_v9 = vand.u32 4294901760, %v4464_v17  ;;  %v892_v0 = vand.u32 4294901760, %v4465_v60  ;;  %v4468_v55 = vld [vmem:[#allocation98_spill] sm:$0xff]  ;;  %v4469_v43 = vld [vmem:[#allocation99_spill] sm:$0xff]  ;;  %1987 = vmatpush3.bf16.msra.mxu1 %v3689_v23 }
 0x171   : > { %v3843_v54 = vpack.c.bf16 %v877_v37, %v876_v46  ;;  %v893_v30 = vand.u32 4294901760, %v4466_v29  ;;  %v878_v40 = vand.u32 4294901760, %v4467_v27  ;;  %v3849_v34 = vpack.c.bf16 %v909_v8, %v908_v16  ;;  %v4470_v46 = vld [vmem:[#allocation100_spill] sm:$0xff]  ;;  %v4471_v28 = vld [vmem:[#allocation102_spill] sm:$0xff]  ;;  %v4472_v60 = vld [vmem:[#allocation103_spill] sm:$0xff]  ;;  %1988 = vmatprep.subr.bf16.mxu1 %v3729_v42  ;;  %1967 = vmatpush3.bf16.msra.mxu0 %v3713_v57 }
 0x172   : > { %v3851_v26 = vpack.c.bf16 %v861_v9, %v860_v19  ;;  %v879_v21 = vand.u32 4294901760, %v4468_v55  ;;  %v910_v39 = vand.u32 4294901760, %v4469_v43  ;;  %v911_v37 = vand.u32 4294901760, %v4470_v46  ;;  %v4473_v16 = vld [vmem:[#allocation104_spill] sm:$0xff]  ;;  %v4474_v19 = vld [vmem:[#allocation105_spill] sm:$0xff]  ;;  %v4475_v27 = vld [vmem:[#allocation107_spill] sm:$0xff]  ;;  %1968 = vmatprep.subr.bf16.mxu0 %v3747_v38 }
 0x173   : > { %v3856_v2 = vpack.c.bf16 %v893_v30, %v892_v0  ;;  %v862_v17 = vand.u32 4294901760, %v4471_v28  ;;  %v863_v29 = vand.u32 4294901760, %v4472_v60  ;;  %v894_v8 = vand.u32 4294901760, %v4473_v16  ;;  %v4476_v30 = vld [vmem:[#allocation108_spill] sm:$0xff]  ;;  %v4477_v46 = vld [vmem:[#allocation109_spill] sm:$0xff]  ;;  %v4479_v60 = vld [vmem:[#allocation111_spill] sm:$0xff] }
 0x174   : > { %v3862_v35 = vpack.c.bf16 %v879_v21, %v878_v40  ;;  %v895_v9 = vand.u32 4294901760, %v4474_v19  ;;  %v880_v55 = vand.u32 4294901760, %v4475_v27  ;;  %v3868_v14 = vpack.c.bf16 %v911_v37, %v910_v39  ;;  %v4478_v40 = vld [vmem:[#allocation110_spill] sm:$0xff]  ;;  %v4480_v19 = vld [vmem:[#allocation112_spill] sm:$0xff]  ;;  %v4481_v39 = vld [vmem:[#allocation113_spill] sm:$0xff]  ;;  %1989 = vmatpush3.bf16.msra.mxu1 %v3719_v58 }
 0x175   : > { %v3870_v0 = vpack.c.bf16 %v863_v29, %v862_v17  ;;  %v881_v43 = vand.u32 4294901760, %v4476_v30  ;;  %v912_v28 = vand.u32 4294901760, %v4477_v46  ;;  %v913_v21 = vand.u32 4294901760, %v4478_v40  ;;  %v4482_v17 = vld [vmem:[#allocation114_spill] sm:$0xff]  ;;  %v4483_v30 = vld [vmem:[#allocation115_spill] sm:$0xff]  ;;  %1990 = vmatprep.subr.bf16.mxu1 %v3759_v51  ;;  %1969 = vmatpush3.bf16.msra.mxu0 %v3736_v36 }
 0x176   : > { %v3875_v53 = vpack.c.bf16 %v895_v9, %v894_v8  ;;  %v864_v16 = vand.u32 4294901760, %v4479_v60  ;;  %v865_v27 = vand.u32 4294901760, %v4480_v19  ;;  %v896_v37 = vand.u32 4294901760, %v4481_v39  ;;  %v4484_v9 = vld [vmem:[#allocation116_spill] sm:$0xff]  ;;  %v4485_v60 = vld [vmem:[#allocation117_spill] sm:$0xff]  ;;  %v4487_v39 = vld [vmem:[#allocation119_spill] sm:$0xff]  ;;  %1970 = vmatprep.subr.bf16.mxu0 %v3775_v31 }
 0x177   : > { %v3881_v3 = vpack.c.bf16 %v881_v43, %v880_v55  ;;  %v897_v29 = vand.u32 4294901760, %v4482_v17  ;;  %v882_v46 = vand.u32 4294901760, %v4483_v30  ;;  %v3887_v11 = vpack.c.bf16 %v913_v21, %v912_v28  ;;  %v4486_v55 = vld [vmem:[#allocation118_spill] sm:$0xff]  ;;  %v4489_v28 = vld [vmem:[#allocation121_spill] sm:$0xff] }
 0x178   : > { %v3889_v8 = vpack.c.bf16 %v865_v27, %v864_v16  ;;  %v883_v40 = vand.u32 4294901760, %v4484_v9  ;;  %v914_v19 = vand.u32 4294901760, %v4485_v60  ;;  %v915_v43 = vand.u32 4294901760, %v4486_v55  ;;  %v4490_v16 = vld [vmem:[#allocation122_spill] sm:$0xff]  ;;  %v4491_v9 = vld [vmem:[#allocation123_spill] sm:$0xff]  ;;  %1991 = vmatpush3.bf16.msra.mxu1 %v3742_v49 }
 0x179   : > { %v3894_v4 = vpack.c.bf16 %v897_v29, %v896_v37  ;;  %v866_v17 = vand.u32 4294901760, %v4487_v39  ;;  %v867_v30 = vand.u32 4294901760, %v4488_v63  ;;  %v898_v21 = vand.u32 4294901760, %v4489_v28  ;;  %v4492_v29 = vld [vmem:[#allocation124_spill] sm:$0xff]  ;;  %v4493_v39 = vld [vmem:[#allocation125_spill] sm:$0xff]  ;;  %v4496_v28 = vld [vmem:[#allocation127_spill] sm:$0xff]  ;;  %1992 = vmatprep.subr.bf16.mxu1 %v3792_v20  ;;  %1971 = vmatpush3.bf16.msra.mxu0 %v3766_v15 }
 0x17a   : > { %v3900_v23 = vpack.c.bf16 %v883_v40, %v882_v46  ;;  %v899_v27 = vand.u32 4294901760, %v4490_v16  ;;  %v884_v60 = vand.u32 4294901760, %v4491_v9  ;;  %v3906_v42 = vpack.c.bf16 %v915_v43, %v914_v19  ;;  %v4495_v46 = vld [vmem:[#allocation126_spill] sm:$0xff]  ;;  %v4498_v19 = vld [vmem:[#allocation129_spill] sm:$0xff]  ;;  %1972 = vmatprep.subr.bf16.mxu0 %v3808_v59 }
 0x17b   : > { %v3908_v37 = vpack.c.bf16 %v867_v30, %v866_v17  ;;  %v885_v55 = vand.u32 4294901760, %v4492_v29  ;;  %v916_v63 = vand.u32 4294901760, %v4493_v39  ;;  %v917_v40 = vand.u32 4294901760, %v4495_v46  ;;  %v4499_v17 = vld [vmem:[#allocation130_spill] sm:$0xff]  ;;  %v4500_v29 = vld [vmem:[#allocation131_spill] sm:$0xff] }
 0x17c   : > { %v3913_v57 = vpack.c.bf16 %v899_v27, %v898_v21  ;;  %v868_v16 = vand.u32 4294901760, %v4496_v28  ;;  %v869_v9 = vand.u32 4294901760, %v4497_v50  ;;  %v900_v43 = vand.u32 4294901760, %v4498_v19  ;;  %v4501_v27 = vld [vmem:[#allocation132_spill] sm:$0xff]  ;;  %v4503_v51 = vld [vmem:[#allocation134_spill] sm:$0xff]  ;;  %1993 = vmatpush3.bf16.msra.mxu1 %v3772_v5  ;;  %v340_v5 = vld [vmem:[#allocation6] sm:$0xff] }
 0x17d   : > { %v3919_v38 = vpack.c.bf16 %v885_v55, %v884_v60  ;;  %v901_v30 = vand.u32 4294901760, %v4499_v17  ;;  %v886_v39 = vand.u32 4294901760, %v4500_v29  ;;  %v1111_v58 = vpack.c.bf16 %v917_v40, %v916_v63  ;;  %v4504_v55 = vld [vmem:[#allocation135_spill] sm:$0xff]  ;;  %v4505_v19 = vld [vmem:[#allocation136_spill] sm:$0xff]  ;;  %v4506_v29 = vld [vmem:[#allocation137_spill] sm:$0xff]  ;;  %1994 = vmatprep.subr.bf16.mxu1 %v3819_v6  ;;  %1973 = vmatpush3.bf16.msra.mxu0 %v3799_v41 }
 0x17e   : > { %4494 = vst [vmem:[#allocation42_spill] sm:$0xff] %v3913_v57  ;;  %v1087_v21 = vpack.c.bf16 %v869_v9, %v868_v16  ;;  %v887_v46 = vand.u32 4294901760, %v4501_v27  ;;  %v918_v28 = vand.u32 4294901760, %v4502_v33  ;;  %v919_v60 = vand.u32 4294901760, %v4503_v51  ;;  %v4507_v40 = vld [vmem:[#allocation138_spill] sm:$0xff] }
 0x17f   : > { %v1103_v50 = vpack.c.bf16 %v901_v30, %v900_v43  ;;  %v870_v1 = vand.u32 4294901760, %v4504_v55  ;;  %v871_v57 = vand.u32 4294901760, %v4505_v19  ;;  %v902_v36 = vand.u32 4294901760, %v4506_v29 }
 0x180   : > { %v1096_v17 = vpack.c.bf16 %v887_v46, %v886_v39  ;;  %v903_v63 = vand.u32 4294901760, %v3520_v22  ;;  %v888_v16 = vand.u32 4294901760, %v4507_v40  ;;  %v1112_v33 = vpack.c.bf16 %v919_v60, %v918_v28  ;;  %1995 = vmatpush3.bf16.msra.mxu1 %v3805_v13  ;;  %1841 = vmatmul.mubr.msk.bf16.vlgmr.msra.gmra.mrb[8].mxu0 %vm1815_vm14, %v3266_v61 }
 0x181   : > { %v1088_v31 = vpack.c.bf16 %v871_v57, %v870_v1  ;;  %v889_v9 = vand.u32 4294901760, %v3529_v56  ;;  %v920_v43 = vand.u32 4294901760, %v3532_v62  ;;  %v921_v49 = vand.u32 4294901760, %v3535_v52  ;;  %2024 = vmatprep.subr.bf16.mxu1 %v3830_v47  ;;  %1850 = vmatprep.mubr.msk.bf16.mxu0 %vm1824_vm0, %v3266_v61 }
 0x182   : > { %v1104_v30 = vpack.c.bf16 %v903_v63, %v902_v36  ;;  %v872_v39 = vand.u32 4294901760, %v3541_v24  ;;  %v873_v27 = vand.u32 4294901760, %v3544_v18  ;;  %v4508_v22 = vand.u32 4294901760, %v4451_v48  ;;  %v1509_v18 = vld [vmem:[#allocation12] sm:$0xff] (!%p1860_p13) }
 0x183   : > { %v4509_v20 = vand.u32 4294901760, %v4456_v44  ;;  %v1097_v57 = vpack.c.bf16 %v889_v9, %v888_v16  ;;  %v904_v56 = vand.u32 4294901760, %v3547_v7  ;;  %v905_v62 = vand.u32 4294901760, %v3552_v25  ;;  %1847 = vmatmul.mubr.msk.bf16.vlgmr.msra.gmra.mrb[8].mxu1 %vm4512_vm6, %v3266_v61  ;;  %v1510_v7 = vld [vmem:[#allocation12 + $0x8] sm:$0xff] (!%p1860_p13) }
 0x184   : > { %v1113_v15 = vpack.c.bf16 %v921_v49, %v920_v43  ;;  %v1089_v52 = vpack.c.bf16 %v873_v27, %v872_v39  ;;  %2025 = vmatpush3.bf16.msra.mxu1 %v3837_v32  ;;  %1856 = vmatprep.mubr.msk.bf16.mxu1 %vm1830_vm2, %v3266_v61  ;;  %vm344_vm8 = vcmask 7168   ;;  %v1330_v27 = vld [vmem:[#allocation5] sm:$0xff]  ;;  %v2083_v45 = vpack.c.bf16 (!%p1860_p13), %v1510_v7, %v1509_v18 }
 0x185   : > { %v1090_v1 = vpack.c.bf16 %v4509_v20, %v4508_v22  ;;  %v1105_v24 = vpack.c.bf16 %v905_v62, %v904_v56  ;;  %2026 = vmatprep.subr.bf16.mxu1 %v3849_v34  ;;  %v4513_v25 = vld [vmem:[#allocation42_spill] sm:$0xff]  ;;  %v1526_v62 = vld [vmem:[#allocation12 + $0x88] sm:$0xff] (!%p1860_p13) }
 0x186   : > { %v1525_v56 = vld [vmem:[#allocation12 + $0x80] sm:$0xff] (!%p1860_p13) }
 0x187   : > { %2002 = vmatprep.subr.bf16.mxu0 %v1090_v1 }
 0x188   : > { %2003 = vmatpush3.bf16.msra.mxu0 %v3832_v12  ;;  %2027 = vmatpush3.bf16.msra.mxu1 %v3856_v2 }
 0x189   : > { %2004 = vmatprep.subr.bf16.mxu0 %v3843_v54  ;;  %2028 = vmatprep.subr.bf16.mxu1 %v3868_v14 }
 0x18c   : > { %2005 = vmatpush3.bf16.msra.mxu0 %v3851_v26  ;;  %2029 = vmatpush3.bf16.msra.mxu1 %v3875_v53 }
 0x18d   : > { %2006 = vmatprep.subr.bf16.mxu0 %v3862_v35  ;;  %2030 = vmatprep.subr.bf16.mxu1 %v3887_v11 }
 0x190   : > { %2007 = vmatpush3.bf16.msra.mxu0 %v3870_v0  ;;  %2031 = vmatpush3.bf16.msra.mxu1 %v3894_v4 }
 0x191   : > { %2008 = vmatprep.subr.bf16.mxu0 %v3881_v3  ;;  %2032 = vmatprep.subr.bf16.mxu1 %v3906_v42  ;;  %v1167_v42 = vld [vmem:[#allocation4] sm:$0xff] }
 0x194   : > { %2009 = vmatpush3.bf16.msra.mxu0 %v3889_v8  ;;  %2033 = vmatpush3.bf16.msra.mxu1 %v4513_v25  ;;  %v1527_v25 = vld [vmem:[#allocation12 + $0x90] sm:$0xff] (!%p1860_p13) }
 0x195   : > { %2010 = vmatprep.subr.bf16.mxu0 %v3900_v23  ;;  %2034 = vmatprep.subr.bf16.mxu1 %v1111_v58 }
 0x198   : > { %2011 = vmatpush3.bf16.msra.mxu0 %v3908_v37  ;;  %2035 = vmatpush3.bf16.msra.mxu1 %v1103_v50 }
 0x199   : > { %2012 = vmatprep.subr.bf16.mxu0 %v3919_v38  ;;  %2036 = vmatprep.subr.bf16.mxu1 %v1112_v33 }
 0x19c   : > { %2013 = vmatpush3.bf16.msra.mxu0 %v1087_v21  ;;  %2037 = vmatpush3.bf16.msra.mxu1 %v1104_v30 }
 0x19d   : > { %2014 = vmatprep.subr.bf16.mxu0 %v1096_v17  ;;  %2038 = vmatprep.subr.bf16.mxu1 %v1113_v15  ;;  %v2558_v15 = vmov (!%p1860_p13), 0  }
 0x19e   : > { %2263 = vset.pattern.permute.xlu0 (!%p1860_p13), %v2558_v15 }
 0x1a0   : > { %2015 = vmatpush3.bf16.msra.mxu0 %v1088_v31  ;;  %2039 = vmatpush3.bf16.msra.mxu1 %v1105_v24  ;;  %v2081_v24 = vpack.c.bf16 (!%p1860_p13), %v1526_v62, %v1525_v56 }
 0x1a1   : > { %2016 = vmatprep.subr.bf16.mxu0 %v1097_v57 }
 0x1a3   : > { %1859 = vmatmul.mubr.msk.bf16.vlgmr.msra.gmra.mrb[12].mxu1 %vm1833_vm10, %v3266_v61 }
 0x1a4   : > { %2017 = vmatpush3.bf16.msra.mxu0 %v1089_v52 }
 0x1a5   : > { %2082 = vmatprep.subr.bf16.mxu0 (!%p1860_p13), %v2081_v24 }
 0x1a7   : > { %1853 = vmatmul.mubr.msk.bf16.vlgmr.msra.gmra.mrb[12].mxu0 %vm1827_vm9, %v3266_v61 }
 0x1a8   : > { %2084 = vmatpush3.bf16.msra.mxu0 (!%p1860_p13), %v2083_v45 }
 0x1b6   : > { %v342_v41 = vpop.xlane.xlu0 %341 }
 0x1b7   : > { %v343_v13 = vadd.f32 %v342_v41, %v340_v5  ;;  %v1511_v5 = vld [vmem:[#allocation12 + $0x10] sm:$0xff] (!%p1860_p13)  ;;  %v1512_v41 = vld [vmem:[#allocation12 + $0x18] sm:$0xff] (!%p1860_p13) }
 0x1b9   : > { %345 = vst.msk [vmem:[#allocation6] sm:$0xff] %vm344_vm8, %v343_v13  ;;  %v2085_v13 = vpack.c.bf16 (!%p1860_p13), %v1528_v10, %v1527_v25 }
 0x1bb   : > { %2086 = vmatprep.subr.bf16.mxu0 (!%p1860_p13), %v2085_v13 }
 0x1c0   : > { %v1497_v57 = vld [vmem:[#allocation6] sm:$0xff] (!%p1860_p13) }
 0x1c1   : > { %v1498_v52 = vmax.f32 (!%p1860_p13), %v1497_v57, 1.0 }
 0x1c3   : > { %1502 = vperm.xlu0 (!%p1860_p13), %2263, %v1498_v52  }
 0x212   : > { %v1886_v59 = vpop.f32.mrb[0].mxu0 }
 0x213   : > { %v1887_v48 = vpop.f32.mrb[1].mxu0 }
 0x214   : > { %v1888_v44 = vadd.f32 %v1887_v48, %v1886_v59  ;;  %v1889_v47 = vpop.f32.mrb[2].mxu0  ;;  %v1529_v59 = vld [vmem:[#allocation12 + $0xa0] sm:$0xff] (!%p1860_p13)  ;;  %v1530_v48 = vld [vmem:[#allocation12 + $0xa8] sm:$0xff] (!%p1860_p13) }
 0x215   : > { %v1890_v32 = vpop.f32.mrb[3].mxu0  ;;  %v1513_v47 = vld [vmem:[#allocation12 + $0x20] sm:$0xff] (!%p1860_p13) }
 0x216   : > { %v1908_v6 = vpop.f32.mrb[0].mxu1  ;;  %v1531_v32 = vld [vmem:[#allocation12 + $0xb0] sm:$0xff] (!%p1860_p13) }
 0x217   : > { %v1909_v12 = vpop.f32.mrb[1].mxu1 }
 0x218   : > { %v1910_v54 = vadd.f32 %v1909_v12, %v1908_v6  ;;  %v1911_v34 = vpop.f32.mrb[2].mxu1  ;;  %v2087_v6 = vpack.c.bf16 (!%p1860_p13), %v1512_v41, %v1511_v5  ;;  %v1514_v12 = vld [vmem:[#allocation12 + $0x28] sm:$0xff] (!%p1860_p13) }
 0x219   : > { %v1912_v26 = vpop.f32.mrb[3].mxu1  ;;  %v2091_v34 = vpack.c.bf16 (!%p1860_p13), %v1514_v12, %v1513_v47 }
 0x21a   : > { %v1243_v2 = vadd.f32 %v1910_v54, %v1888_v44  ;;  %v2089_v44 = vpack.c.bf16 (!%p1860_p13), %v1530_v48, %v1529_v59  ;;  %v1532_v54 = vld [vmem:[#allocation12 + $0xb8] sm:$0xff] (!%p1860_p13)  ;;  %2088 = vmatpush3.bf16.msra.mxu0 (!%p1860_p13), %v2087_v6 }
 0x21b   : > { %v2093_v26 = vpack.c.bf16 (!%p1860_p13), %v1532_v54, %v1531_v32 }
 0x21c   : > { %2090 = vmatprep.subr.bf16.mxu0 (!%p1860_p13), %v2089_v44 }
 0x21e   : > { %2092 = vmatpush3.bf16.msra.mxu0 (!%p1860_p13), %v2091_v34 }
 0x21f   : > { %2094 = vmatprep.subr.bf16.mxu0 (!%p1860_p13), %v2093_v26 }
 0x232   : > { %v1930_v35 = vpop.f32.mrb[4].mxu0 }
 0x233   : > { %v1931_v14 = vpop.f32.mrb[5].mxu0 }
 0x234   : > { %v1932_v61 = vadd.f32 %v1931_v14, %v1930_v35  ;;  %v1933_v53 = vpop.f32.mrb[6].mxu0  ;;  %v1516_v35 = vld [vmem:[#allocation12 + $0x38] sm:$0xff] (!%p1860_p13)  ;;  %v1533_v14 = vld [vmem:[#allocation12 + $0xc0] sm:$0xff] (!%p1860_p13) }
 0x235   : > { %v1934_v11 = vpop.f32.mrb[7].mxu0 }
 0x236   : > { %v1952_v0 = vpop.f32.mrb[4].mxu1  ;;  %v1283_v8 = vadd.f32 %v1932_v61, %v1243_v2  ;;  %v1515_v2 = vld [vmem:[#allocation12 + $0x30] sm:$0xff] (!%p1860_p13)  ;;  %v1518_v11 = vld [vmem:[#allocation12 + $0x48] sm:$0xff] (!%p1860_p13) }
 0x237   : > { %v1953_v3 = vpop.f32.mrb[5].mxu1  ;;  %v2095_v61 = vpack.c.bf16 (!%p1860_p13), %v1516_v35, %v1515_v2 }
 0x238   : > { %v1954_v4 = vadd.f32 %v1953_v3, %v1952_v0  ;;  %v1955_v23 = vpop.f32.mrb[6].mxu1  ;;  %v1534_v0 = vld [vmem:[#allocation12 + $0xc8] sm:$0xff] (!%p1860_p13)  ;;  %v1517_v3 = vld [vmem:[#allocation12 + $0x40] sm:$0xff] (!%p1860_p13) }
 0x239   : > { %v1956_v37 = vpop.f32.mrb[7].mxu1  ;;  %v2097_v53 = vpack.c.bf16 (!%p1860_p13), %v1534_v0, %v1533_v14  ;;  %2096 = vmatpush3.bf16.msra.mxu0 (!%p1860_p13), %v2095_v61  ;;  %v2099_v23 = vpack.c.bf16 (!%p1860_p13), %v1518_v11, %v1517_v3 }
 0x23a   : > { %v1323_v38 = vadd.f32 %v1954_v4, %v1283_v8  ;;  %v1535_v8 = vld [vmem:[#allocation12 + $0xd0] sm:$0xff] (!%p1860_p13)  ;;  %v1536_v4 = vld [vmem:[#allocation12 + $0xd8] sm:$0xff] (!%p1860_p13) }
 0x23b   : > { %2098 = vmatprep.subr.bf16.mxu0 (!%p1860_p13), %v2097_v53  ;;  %v1519_v37 = vld [vmem:[#allocation12 + $0x50] sm:$0xff] (!%p1860_p13) }
 0x23c   : > { %v1328_v58 = vadd.f32 %v1323_v38, %v1167_v42  ;;  %v2101_v42 = vpack.c.bf16 (!%p1860_p13), %v1536_v4, %v1535_v8  ;;  %v1520_v38 = vld [vmem:[#allocation12 + $0x58] sm:$0xff] (!%p1860_p13) }
 0x23d   : > { %2100 = vmatpush3.bf16.msra.mxu0 (!%p1860_p13), %v2099_v23 }
 0x23e   : > { %1329 = vst [vmem:[#allocation4] sm:$0xff] %v1328_v58  ;;  %v1537_v58 = vld [vmem:[#allocation12 + $0xe0] sm:$0xff] (!%p1860_p13)  ;;  %2102 = vmatprep.subr.bf16.mxu0 (!%p1860_p13), %v2101_v42 }
 0x253   : > { %v1974_v21 = vpop.f32.mrb[8].mxu0 }
 0x254   : > { %v1975_v46 = vpop.f32.mrb[9].mxu0 }
 0x255   : > { %v1976_v50 = vadd.f32 %v1975_v46, %v1974_v21  ;;  %v1977_v51 = vpop.f32.mrb[10].mxu0  ;;  %v1538_v21 = vld [vmem:[#allocation12 + $0xe8] sm:$0xff] (!%p1860_p13)  ;;  %v2103_v46 = vpack.c.bf16 (!%p1860_p13), %v1520_v38, %v1519_v37 }
 0x256   : > { %v1996_v28 = vpop.f32.mrb[8].mxu1  ;;  %v1978_v55 = vpop.f32.mrb[11].mxu0  ;;  %v1522_v51 = vld [vmem:[#allocation12 + $0x68] sm:$0xff] (!%p1860_p13) }
 0x257   : > { %v1997_v60 = vpop.f32.mrb[9].mxu1  ;;  %v1540_v55 = vld [vmem:[#allocation12 + $0xf8] sm:$0xff] (!%p1860_p13)  ;;  %2104 = vmatpush3.bf16.msra.mxu0 (!%p1860_p13), %v2103_v46 }
 0x258   : > { %v1998_v19 = vadd.f32 %v1997_v60, %v1996_v28  ;;  %v1999_v17 = vpop.f32.mrb[10].mxu1  ;;  %v2105_v28 = vpack.c.bf16 (!%p1860_p13), %v1538_v21, %v1537_v58  ;;  %v1539_v60 = vld [vmem:[#allocation12 + $0xf0] sm:$0xff] (!%p1860_p13) }
 0x259   : > { %v2000_v29 = vpop.f32.mrb[11].mxu1  ;;  %v2109_v17 = vpack.c.bf16 (!%p1860_p13), %v1540_v55, %v1539_v60 }
 0x25a   : > { %v1406_v36 = vadd.f32 %v1998_v19, %v1976_v50  ;;  %v1521_v50 = vld [vmem:[#allocation12 + $0x60] sm:$0xff] (!%p1860_p13)  ;;  %2106 = vmatprep.subr.bf16.mxu0 (!%p1860_p13), %v2105_v28  ;;  %v1523_v29 = vld [vmem:[#allocation12 + $0x70] sm:$0xff] (!%p1860_p13) }
 0x25b   : > { %v2107_v19 = vpack.c.bf16 (!%p1860_p13), %v1522_v51, %v1521_v50 }
 0x25d   : > { %2108 = vmatpush3.bf16.msra.mxu0 (!%p1860_p13), %v2107_v19 }
 0x25e   : > { %2110 = vmatprep.subr.bf16.mxu0 (!%p1860_p13), %v2109_v17 }
 0x276   : > { %v2040_v16 = vpop.f32.mrb[12].mxu1 }
 0x277   : > { %v2041_v9 = vpop.f32.mrb[13].mxu1 }
 0x278   : > { %v2042_v49 = vadd.f32 %v2041_v9, %v2040_v16  ;;  %v2043_v39 = vpop.f32.mrb[14].mxu1 }
 0x279   : > { %v2044_v22 = vpop.f32.mrb[15].mxu1  ;;  %v1861_v39 = vld [vmem:[%s4517_s19] ss:$0 sm:$0xff] (!%p1860_p13) }
 0x27a   : > { %v2018_v63 = vpop.f32.mrb[12].mxu0 }
 0x27b   : > { %v2019_v40 = vpop.f32.mrb[13].mxu0 }
 0x27c   : > { %v2020_v33 = vadd.f32 %v2019_v40, %v2018_v63  ;;  %v2021_v31 = vpop.f32.mrb[14].mxu0  ;;  %v1503_v40 = vpop.permute.xlu0 (!%p1860_p13), %1502 }
 0x27d   : > { %v2022_v43 = vpop.f32.mrb[15].mxu0  ;;  %2264 = vrcp.f32 (!%p1860_p13), %v1503_v40 }
 0x27e   : > { %v1446_v30 = vadd.f32 %v2020_v33, %v1406_v36  ;;  %1496 = sbr.rel (%p1860_p13) target bundleno = 1185 (0x4a1), region = 88  ;;  %v1524_v36 = vld [vmem:[#allocation12 + $0x78] sm:$0xff] (!%p1860_p13) }
 0x27f   : > { %v2111_v63 = vpack.c.bf16 (!%p1860_p13), %v1524_v36, %v1523_v29  ;;  %v1499_v33 = vld [vmem:[#allocation4] sm:$0xff] (!%p1860_p13) }
 0x280   : > { %v1486_v20 = vadd.f32 %v2042_v49, %v1446_v30 }
 0x281   : > { %2112 = vmatpush3.bf16.msra.mxu0 (!%p1860_p13), %v2111_v63 }
 0x282   : > { %v1491_v1 = vadd.f32 %v1486_v20, %v1330_v27 }
 0x284   : > { %1492 = vst [vmem:[#allocation5] sm:$0xff] %v1491_v1 }
 0x287   : > { %v2265_v31 = vpop.eup %2264 }
 0x288   : > { %v1506_v43 = vmul.f32 %v2265_v31, %v1499_v33 }
 0x28b   : > { %v1507_v16 = vld [vmem:[#allocation5] sm:$0xff] }
 0x28c   : > { %v1508_v9 = vmul.f32 %v2265_v31, %v1507_v16 }
 0x28e   : > { %1612 = vmatprep.mubr.f32.mxu0 %v1508_v9 }
 0x28f   : > { %1613 = vmatmul.mubr.f32.vlgmr.msra.gmra.mrb[0].mxu0 %v1506_v43 }
 0x362   : > { %v2078_v30 = vpop.f32.mrb[0].mxu0 }
 0x363   : > { %v2079_v49 = vpop.f32.mrb[1].mxu0 }
 0x364   : > { %v2080_v27 = vadd.f32 %v2079_v49, %v2078_v30 }
 0x366   : > { %v1615_v22 = vadd.f32 %v2080_v27, %v1861_v39 }
 0x368   : > { %1618 = vmax.xlane.f32.xlu0 %v1615_v22 }
 0x3f5   : > { %v1619_v20 = vpop.xlane.xlu0 %1618 }
 0x3f6   : > { %v1620_v1 = vsub.f32 %v1615_v22, %v1619_v20 }
 0x3f8   : > { %v1621_v57 = vmul.f32 1.442695, %v1620_v1 }
 0x3fa   : > { %2266 = vpow2.f32 %v1621_v57 }
 0x404   : > { %v2267_v56 = vpop.eup %2266 }
 0x405   : > { %1623 = vadd.xlane.f32.xlu1 %v2267_v56 }
 0x492   : > { %v1624_v62 = vpop.xlane.xlu1 %1623 }
 0x493   : > { %2268 = vrcp.f32 %v1624_v62 }
 0x49d   : > { %v2269_v15 = vpop.eup %2268 }
 0x49e   : > { %v1626_v52 = vmul.f32 %v2269_v15, %v2267_v56 }
 0x4a0   : > { %1627 = vst [vmem:[%s4518_s16] sm:$0xff] %v1626_v52 }
 0x4a1 PF: > { %s4519_s15 = sld [smem:[#allocation33_spill]]  ;;  %s1863_s27 = sshll.u32 %s2520_s9, 7 }
 0x4a2   : > { %s4520_s4 = sld [smem:[#allocation143_spill]]  ;;  %s4521_s17 = scalar_lea.vmem [#allocation14], %s2798_s6 }
 0x4a3   : > { %s1642_s24 = sshll.u32 %s4521_s17, 4  ;;  %s4522_s18 = sand.u32 1, %s2496_s29   ;;  %s1643_s24 = int_to_ptr.vmem [resolvable:$true] %s1642_s24 }
 0x4a4   : > { %s1629_s5 = scalar_lea.sflag [#allocation11], %s4522_s18  ;;  %s2386_s13 = scalar_lea.vmem %s1643_s24, 128 }
 0x4a5   : > { %p2387_p0 = scmp.ne.s32.totalorder %s1643_s24, %s2386_s13  ;;  %s2559_s22 = smov [#allocation14]  }
 0x4a6   : > { %s2390_s21 = sshll.u32 %s2559_s22, 4  ;;  %s2391_s21 = int_to_ptr.vmem [resolvable:$false] %s2390_s21 }
 0x4a7   : > { %p4523_p2 = scmp.ne.s32.totalorder %s4519_s15, 0  ;;  %s2392_s14 = scalar_lea.vmem %s2391_s21, 256 }
 0x4a8   : > { %s4019_s23 = scalar_lea.hbm %s4520_s4, %s1863_s27  ;;  %p2393_p8 = scmp.lt.s32.totalorder %s1643_s24, %s2391_s21 }
 0x4a9   : > { %p2388_p3 = pnand %p2387_p0, %p4523_p2  ;;  %p2394_p11 = scmp.lt.s32.totalorder %s2392_s14, %s2386_s13 }
 0x4ab   : > { %p2389_p5 = pneg %p2388_p3  ;;  %p2395_p1 = por %p2394_p11, %p2393_p8 }
 0x4ad   : > { %p2396_p4 = pnand %p2395_p1, %p2389_p5 }
 0x4af   : > { %2399 = shalt.err (!%p2396_p4)
}
 0x4b0   : > { %s2400_s9 = scalar_lea.hbm %s4019_s23, 128  ;;  %s2404_s20 = scalar_lea.hbm %s4520_s4, 256 }
 0x4b1   : > { %p2401_p12 = scmp.ne.s32.totalorder %s4019_s23, %s2400_s9  ;;  %p2405_p6 = scmp.lt.u32.totalorder %s4019_s23, %s4520_s4 }
 0x4b2   : > { %p2406_p9 = scmp.lt.u32.totalorder %s2404_s20, %s2400_s9  ;;  %p2408_p0 = scmp.lt.u32.totalorder %s2400_s9, %s4019_s23 }
 0x4b3   : > { %p2402_p10 = pnand %p2401_p12, %p4523_p2 }
 0x4b4   : > { %p2407_p13 = por %p2406_p9, %p2405_p6 }
 0x4b5   : > { %p2403_p7 = pneg %p2402_p10 }
 0x4b6   : > { %p2409_p3 = por %p2408_p0, %p2407_p13 }
 0x4b8   : > { %p2410_p5 = pnand %p2409_p3, %p2403_p7 }
 0x4ba   : > { %2413 = shalt.err (!%p2410_p5)
}
 0x4bb   : > { %2119 = dma.vmem_to_hbm [thread:$0]  (%p4523_p2), %s1643_s24, 128, %s4019_s23, %s1629_s5  }
 0x4bc PF: > { %s4524_s10 = sld [smem:[#allocation26_spill]]  ;;  %s4525_s26 = sld [smem:[#allocation34_spill]] }
 0x4bd   : > { %p2136_p8 = scmp.ge.s32.totalorder %s2532_s12, 2 }
 0x4c2   : > { %s1654_s3 = sand.u32 1, %s4524_s10   ;;  %p4526_p11 = scmp.ne.s32.totalorder %s4525_s26, 0 }
 0x4c3   : > { %s1655_s30 = scalar_lea.sflag [#allocation11], %s1654_s3 }
 0x4c4   : > { %p2130_p1 = pnand %p2136_p8, %p4526_p11 }
 0x4c6   : > { %2487 = dma.done.wait (!%p2130_p1), %s1655_s30, 128  }
 0x4c7   : > { %2489 = vsyncadd (!%p2130_p1), %s1655_s30, 4294967168  ;;  %s26_s12 = sadd.s32 1, %s2532_s12   ;;  %s4527_s25 = sld [smem:[#allocation27_spill]] }
 0x4c8   : > { %p23_p4 = scmp.ge.s32.totalorder %s26_s12, 6   ;;  %s4528_s30 = sld [smem:[#allocation37_spill]] }
 0x4c9   : > { %s4529_s6 = sld [smem:[#allocation28_spill]]  ;;  %s4530_s7 = sld [smem:[#allocation29_spill]] }
 0x4ca   : > { %s4531_s8 = sld [smem:[#allocation38_spill]]  ;;  %s4532_s0 = sld [smem:[#allocation31_spill]] }
 0x4cb   : > { %s4533_s9 = sld [smem:[#allocation32_spill]]  ;;  %s4534_s10 = sld [smem:[#allocation35_spill]] }
 0x4cc   : > { %s4535_s11 = sld [smem:[#allocation36_spill]]  ;;  %s4536_s28 = smov %s2496_s29 }
 0x4cd   : > { %s4537_s29 = smov %s4527_s25  ;;  %25 = sbr.rel (!%p23_p4) target bundleno = 23 (0x17), region = 181 }
 0x4d4   :  { %1660 = vsyncpa [#allocation10], 1 }
 0x4d5   :  { %1662 = vsyncpa [#allocation10 + $0x1], 1 }
 0x4d6   :  { %1663 = vsyncpa [#allocation13], 1 }
 0x4d7   :  { %1664 = vsyncpa [#allocation11], 1 }
 0x4d8   :  { %1666 = vsyncpa [#allocation11 + $0x1], 1 }
 0x4d9   :  { %1667 = vsyncmov [#allocation3] }
 0x4dc   :  { %s1668_s19 = vpop.sfrf %1667 }
 0x4dd   :  { %p1866_p2 = scmp.ne.s32.totalorder %s1668_s19, 0 }
 0x4df   :  { %1672 = shalt.err (%p1866_p2)  }
 0x4e0   :  { %1674 = vsyncmov [#allocation3 + $0x1] }
 0x4e3   :  { %s1675_s16 = vpop.sfrf %1674 }
 0x4e4   :  { %p1867_p12 = scmp.ne.s32.totalorder %s1675_s16, 0 }
 0x4e6   :  { %1679 = shalt.err (%p1867_p12)  }

</bundles_post_ra>
